<compile_context>
chip_gen: v6e
topology: v6e:2x2x1
jax: 0.10.0
libtpu: 0.0.40
codegen_flags: <defaults>
</compile_context>

<pallas_src>
import functools

import jax
import jax.numpy as jnp
from jax.experimental import pallas as pl
from jax.experimental.pallas import tpu as pltpu


# ----------------------------- Pallas kernel -------------------------------

def _decoder_kernel(dec_ref, wx_ref, bx_ref, whh_ref, wop_ref, bop_ref,
                    out_ref, gx_scr, h_all_scr, *, steps, batch):
    E = whh_ref.shape[0]
    fin = dec_ref.shape[-1]
    opw = wop_ref.shape[-1]

    # One-shot, time-independent input projection for ALL timesteps of this
    # batch block (dec_linear already folded into wx/bx by the wrapper).
    x2d = dec_ref[...].reshape(steps * batch, fin)
    gx = (jnp.dot(x2d, wx_ref[...], preferred_element_type=jnp.float32)
          + bx_ref[...])                                     # (T*bb, 4E)
    gx_scr[...] = gx.reshape(steps, batch, 4 * E)

    whh = whh_ref[...]                      # hoisted: loaded once, reused T times
    h = jnp.zeros((batch, E), jnp.float32)
    c = jnp.zeros((batch, E), jnp.float32)

    # Recurrence: only h @ Whh is truly serial.  T is small -> static unroll.
    for t in range(steps):
        gates = gx_scr[t] + jnp.dot(h, whh,
                                    preferred_element_type=jnp.float32)  # (bb, 4E)
        # One full-vreg sigmoid covers all four gates: the g-gate columns were
        # pre-scaled by 2 in the wrapper, so tanh(g) = 2*sigmoid(2*g) - 1.
        s = jax.nn.sigmoid(gates)
        i_g = s[:, 0:E]
        f_g = s[:, E:2 * E]
        g_g = 2.0 * s[:, 2 * E:3 * E] - 1.0
        o_g = s[:, 3 * E:4 * E]
        c = f_g * c + i_g * g_g
        h = o_g * jnp.tanh(c)
        h_all_scr[t] = h                    # aligned full-tile store

    # Batched op projection + outputActivation epilogue (once, not per step).
    h2d = h_all_scr[...].reshape(steps * batch, E)
    fut = (jnp.dot(h2d, wop_ref[...], preferred_element_type=jnp.float32)
           + bop_ref[...])                                   # (T*bb, 8)
    # [muX, muY, exp(sigX), exp(sigY), tanh(rho), 0, 0, 0] via lane select
    col = jax.lax.broadcasted_iota(jnp.int32, fut.shape, 1)
    act = jnp.where(col < 2, fut,
                    jnp.where(col < 4, jnp.exp(fut), jnp.tanh(fut)))
    out_ref[...] = act.reshape(steps, batch, opw)


# ------------------------------ wrapper -------------------------------------

def decoder_forward(dec, lat_enc, lon_enc, params, *, use_maneuvers=True,
                    batch_block=None):
    T, B, E = dec.shape

    w_ih_t = params['w_ih'].T.astype(jnp.float32)            # (E, 4E)
    b_gate = (params['b_ih'] + params['b_hh']).astype(jnp.float32)

    if use_maneuvers:
        # repeat/permute + cat is layout glue; done in plain JAX
        lat_r = jnp.broadcast_to(lat_enc[None, :, :], (T, B, lat_enc.shape[-1]))
        lon_r = jnp.broadcast_to(lon_enc[None, :, :], (T, B, lon_enc.shape[-1]))
        dec_in = jnp.concatenate([dec, lat_r, lon_r], axis=-1)
        # fold dec_linear into the LSTM input matmul (exact: the PyTorch module
        # has no nonlinearity between dec_linear and the LSTM input)
        w_x = params['w_dec'].T.astype(jnp.float32) @ w_ih_t   # (Fin, 4E)
        b_x = params['b_dec'].astype(jnp.float32) @ w_ih_t + b_gate
    else:
        dec_in = dec
        w_x = w_ih_t
        b_x = b_gate

    whh_t = params['w_hh'].T.astype(jnp.float32)              # (E, 4E)

    # tanh-as-sigmoid trick: double the g-gate (columns 2E:3E) of the input
    # and hidden projections + bias so ONE full-vreg sigmoid in the kernel
    # covers all four gates (PyTorch gate order i, f, g, o).
    gate_scale = jnp.concatenate([jnp.ones((2 * E,), jnp.float32),
                                  jnp.full((E,), 2.0, jnp.float32),
                                  jnp.ones((E,), jnp.float32)])
    w_x = (w_x * gate_scale[None, :]).astype(jnp.float32)
    whh_s = (whh_t * gate_scale[None, :]).astype(jnp.float32)
    b_x = (b_x * gate_scale).astype(jnp.float32)

    # Pad op projection width 5 -> 8 lanes (denser epilogue store).
    OPW = 8
    w_op_p = jnp.zeros((E, OPW), jnp.float32).at[:, :5].set(
        params['w_op'].T.astype(jnp.float32))
    b_op_p = jnp.zeros((OPW,), jnp.float32).at[:5].set(
        params['b_op'].astype(jnp.float32))

    # Pad batch to a multiple of the batch block (full 8-sublane occupancy);
    # grid over batch blocks gives v7x both TensorCores via "parallel".
    if batch_block is None:
        batch_block = min(64, max(8, -(-B // 8) * 8))
    bb = batch_block
    assert bb % 8 == 0
    B_pad = -(-B // bb) * bb
    if B_pad != B:
        dec_in = jnp.pad(dec_in, ((0, 0), (0, B_pad - B), (0, 0)))
    dec_in = dec_in.astype(jnp.float32)
    Fin = dec_in.shape[-1]
    nb = B_pad // bb

    kernel = functools.partial(_decoder_kernel, steps=T, batch=bb)

    grid_spec = pltpu.PrefetchScalarGridSpec(
        num_scalar_prefetch=0,
        grid=(nb,),
        in_specs=[
            pl.BlockSpec((T, bb, Fin), lambda b: (0, b, 0)),   # dec (time-major)
            pl.BlockSpec((Fin, 4 * E), lambda b: (0, 0)),      # W_x
            pl.BlockSpec((1, 4 * E), lambda b: (0, 0)),        # b_x
            pl.BlockSpec((E, 4 * E), lambda b: (0, 0)),        # W_hh
            pl.BlockSpec((E, OPW), lambda b: (0, 0)),          # W_op (padded)
            pl.BlockSpec((1, OPW), lambda b: (0, 0)),          # b_op (padded)
        ],
        out_specs=pl.BlockSpec((T, bb, OPW), lambda b: (0, b, 0)),
        scratch_shapes=[
            pltpu.VMEM((T, bb, 4 * E), jnp.float32),   # gates_x, all steps
            pltpu.VMEM((T, bb, E), jnp.float32),       # h, all steps
        ],
    )

    out = pl.pallas_call(
        kernel,
        out_shape=jax.ShapeDtypeStruct((T, B_pad, OPW), jnp.float32),
        grid_spec=grid_spec,
        compiler_params=pltpu.CompilerParams(
            dimension_semantics=("parallel",)),
    )(dec_in, w_x, b_x[None, :], whh_s, w_op_p, b_op_p[None, :])

    return out[:, :B, :5]


# --------------------------- pure-JAX reference ------------------------------

def decoder_ref(dec, lat_enc, lon_enc, params):
    T, B, E = dec.shape
    lat_r = jnp.broadcast_to(lat_enc[None, :, :], (T, B, lat_enc.shape[-1]))
    lon_r = jnp.broadcast_to(lon_enc[None, :, :], (T, B, lon_enc.shape[-1]))
    x = jnp.concatenate([dec, lat_r, lon_r], axis=-1)
    x = x @ params['w_dec'].T + params['b_dec']

    def step(carry, xt):
        h, c = carry
        gates = (xt @ params['w_ih'].T + h @ params['w_hh'].T
                 + params['b_ih'] + params['b_hh'])
        i, f, g, o = jnp.split(gates, 4, axis=-1)
        i = jax.nn.sigmoid(i)
        f = jax.nn.sigmoid(f)
        g = jnp.tanh(g)
        o = jax.nn.sigmoid(o)
        c = f * c + i * g
        h = o * jnp.tanh(c)
        return (h, c), h

    init = (jnp.zeros((B, E), jnp.float32), jnp.zeros((B, E), jnp.float32))
    _, hs = jax.lax.scan(step, init, x)
    fut = hs @ params['w_op'].T + params['b_op']
    muX, muY, sX, sY, rho = jnp.split(fut, 5, axis=-1)
    return jnp.concatenate([muX, muY, jnp.exp(sX), jnp.exp(sY), jnp.tanh(rho)],
                           axis=-1)


# --------------------------------- main --------------------------------------

if __name__ == "__main__":
    # Small shapes consistent with the module.  Per the perf review, the 6
    # maneuver combinations / agents are folded into the batch dim by the
    # caller: B=16 here (multiple of 8), split into batch blocks of 8 so the
    # grid has 2 "parallel" programs (both TensorCores on v7x).
    out_length = 8          # T
    batch = 16              # B  (maneuver combos x agents folded by caller)
    encoder_size = 32       # E (lstm_encoder_size)
    lat_length = 3
    lon_length = 2
    Fin = encoder_size + lat_length + lon_length

    key = jax.random.PRNGKey(0)
    keys = jax.random.split(key, 12)
    scale = 0.1

    params = {
        'w_dec': scale * jax.random.normal(keys[0], (encoder_size, Fin), jnp.float32),
        'b_dec': scale * jax.random.normal(keys[1], (encoder_size,), jnp.float32),
        'w_ih':  scale * jax.random.normal(keys[2], (4 * encoder_size, encoder_size), jnp.float32),
        'w_hh':  scale * jax.random.normal(keys[3], (4 * encoder_size, encoder_size), jnp.float32),
        'b_ih':  scale * jax.random.normal(keys[4], (4 * encoder_size,), jnp.float32),
        'b_hh':  scale * jax.random.normal(keys[5], (4 * encoder_size,), jnp.float32),
        'w_op':  scale * jax.random.normal(keys[6], (5, encoder_size), jnp.float32),
        'b_op':  scale * jax.random.normal(keys[7], (5,), jnp.float32),
    }

    dec = jax.random.normal(keys[8], (out_length, batch, encoder_size), jnp.float32)
    lat_enc = jax.nn.softmax(jax.random.normal(keys[9], (batch, lat_length), jnp.float32), axis=-1)
    lon_enc = jax.nn.softmax(jax.random.normal(keys[10], (batch, lon_length), jnp.float32), axis=-1)

    out = decoder_forward(dec, lat_enc, lon_enc, params, use_maneuvers=True,
                          batch_block=8)
    out = jax.block_until_ready(out)

    ref = decoder_ref(dec, lat_enc, lon_enc, params)
    if not jnp.allclose(out, ref, atol=1e-4, rtol=1e-4):
        raise AssertionError("Pallas kernel does not match JAX reference")

    print("KERNEL_OK")
</pallas_src>

<mosaic_0001>
module attributes {stable_mosaic.version = 11 : i64} {
  func.func @_decoder_kernel(%arg0: i32, %arg1: memref<8x8x37xf32, #tpu.memory_space<vmem>>, %arg2: memref<37x128xf32, #tpu.memory_space<vmem>>, %arg3: memref<1x128xf32, #tpu.memory_space<vmem>>, %arg4: memref<32x128xf32, #tpu.memory_space<vmem>>, %arg5: memref<32x8xf32, #tpu.memory_space<vmem>>, %arg6: memref<1x8xf32, #tpu.memory_space<vmem>>, %arg7: memref<8x8x8xf32, #tpu.memory_space<vmem>>, %arg8: memref<8x8x128xf32, #tpu.memory_space<vmem>>, %arg9: memref<8x8x32xf32, #tpu.memory_space<vmem>>) attributes {dimension_semantics = [#tpu.dimension_semantics<parallel>], iteration_bounds = array<i64: 2>, scalar_prefetch = 0 : i64, scratch_operands = 2 : i64, tpu.core_type = #tpu.core_type<tc>, window_params = [{transform_indices = @transform_0, window_bounds = array<i64: 8, 8, 37>}, {pipeline_mode = #tpu.pipeline_mode<synchronous>, transform_indices = @transform_1, window_bounds = array<i64: 37, 128>}, {pipeline_mode = #tpu.pipeline_mode<synchronous>, transform_indices = @transform_2, window_bounds = array<i64: 1, 128>}, {pipeline_mode = #tpu.pipeline_mode<synchronous>, transform_indices = @transform_3, window_bounds = array<i64: 32, 128>}, {pipeline_mode = #tpu.pipeline_mode<synchronous>, transform_indices = @transform_4, window_bounds = array<i64: 32, 8>}, {pipeline_mode = #tpu.pipeline_mode<synchronous>, transform_indices = @transform_5, window_bounds = array<i64: 1, 8>}, {transform_indices = @transform_6, window_bounds = array<i64: 8, 8, 8>}]} {
    %c0 = arith.constant 0 : index
    %c0_0 = arith.constant 0 : index
    %c0_1 = arith.constant 0 : index
    %0 = vector.load %arg1[%c0, %c0_0, %c0_1] : memref<8x8x37xf32, #tpu.memory_space<vmem>>, vector<8x8x37xf32>
    %1 = vector.shape_cast %0 : vector<8x8x37xf32> to vector<64x37xf32>
    %c0_2 = arith.constant 0 : index
    %c0_3 = arith.constant 0 : index
    %2 = vector.load %arg2[%c0_2, %c0_3] : memref<37x128xf32, #tpu.memory_space<vmem>>, vector<37x128xf32>
    %cst = arith.constant dense<0.000000e+00> : vector<64x128xf32>
    %3 = tpu.matmul %1, %2, %cst {dimension_numbers = #tpu.dot_dimension_numbers<[1], [0], [0], [1], [0, 0, 1, 1], [], []>} : vector<64x37xf32>, vector<37x128xf32>, vector<64x128xf32> -> vector<64x128xf32>
    %c0_4 = arith.constant 0 : index
    %c0_5 = arith.constant 0 : index
    %4 = vector.load %arg3[%c0_4, %c0_5] : memref<1x128xf32, #tpu.memory_space<vmem>>, vector<1x128xf32>
    %5 = vector.broadcast %4 : vector<1x128xf32> to vector<64x128xf32>
    %6 = arith.addf %3, %5 : vector<64x128xf32>
    %7 = vector.shape_cast %6 : vector<64x128xf32> to vector<8x8x128xf32>
    %c0_6 = arith.constant 0 : index
    %c0_7 = arith.constant 0 : index
    %c0_8 = arith.constant 0 : index
    %8 = vector.load %arg8[%c0_6, %c0_7, %c0_8] : memref<8x8x128xf32, #tpu.memory_space<vmem>>, vector<8x8x128xf32>
    tpu.vector_store %arg8[%c0_6, %c0_7, %c0_8], %7 {strides = array<i32>} : memref<8x8x128xf32, #tpu.memory_space<vmem>>, vector<8x8x128xf32>,
    %c0_9 = arith.constant 0 : index
    %c0_10 = arith.constant 0 : index
    %9 = vector.load %arg4[%c0_9, %c0_10] : memref<32x128xf32, #tpu.memory_space<vmem>>, vector<32x128xf32>
    %cst_11 = arith.constant 0.000000e+00 : f32
    %10 = vector.broadcast %cst_11 : f32 to vector<8x32xf32>
    %cst_12 = arith.constant 0.000000e+00 : f32
    %11 = vector.broadcast %cst_12 : f32 to vector<8x32xf32>
    %c0_13 = arith.constant 0 : index
    %c0_14 = arith.constant 0 : index
    %c0_15 = arith.constant 0 : index
    %12 = vector.load %arg8[%c0_13, %c0_14, %c0_15] : memref<8x8x128xf32, #tpu.memory_space<vmem>>, vector<1x8x128xf32>
    %13 = vector.shape_cast %12 : vector<1x8x128xf32> to vector<8x128xf32>
    %cst_16 = arith.constant dense<0.000000e+00> : vector<8x128xf32>
    %14 = tpu.matmul %10, %9, %cst_16 {dimension_numbers = #tpu.dot_dimension_numbers<[1], [0], [0], [1], [0, 0, 1, 1], [], []>} : vector<8x32xf32>, vector<32x128xf32>, vector<8x128xf32> -> vector<8x128xf32>
    %15 = arith.addf %13, %14 : vector<8x128xf32>
    %16 = arith.negf %15 : vector<8x128xf32>
    %17 = math.exp %16 : vector<8x128xf32>
    %cst_17 = arith.constant 1.000000e+00 : f32
    %18 = vector.broadcast %cst_17 : f32 to vector<8x128xf32>
    %19 = arith.addf %18, %17 : vector<8x128xf32>
    %20 = arith.divf %18, %19 : vector<8x128xf32>
    %21 = vector.extract_strided_slice %20 {offsets = [0, 0], sizes = [8, 32], strides = [1, 1]} : vector<8x128xf32> to vector<8x32xf32>
    %22 = vector.extract_strided_slice %20 {offsets = [0, 32], sizes = [8, 32], strides = [1, 1]} : vector<8x128xf32> to vector<8x32xf32>
    %23 = vector.extract_strided_slice %20 {offsets = [0, 64], sizes = [8, 32], strides = [1, 1]} : vector<8x128xf32> to vector<8x32xf32>
    %cst_18 = arith.constant 2.000000e+00 : f32
    %24 = vector.broadcast %cst_18 : f32 to vector<8x32xf32>
    %25 = arith.mulf %24, %23 : vector<8x32xf32>
    %cst_19 = arith.constant 1.000000e+00 : f32
    %26 = vector.broadcast %cst_19 : f32 to vector<8x32xf32>
    %27 = arith.subf %25, %26 : vector<8x32xf32>
    %28 = vector.extract_strided_slice %20 {offsets = [0, 96], sizes = [8, 32], strides = [1, 1]} : vector<8x128xf32> to vector<8x32xf32>
    %29 = arith.mulf %22, %11 : vector<8x32xf32>
    %30 = arith.mulf %21, %27 : vector<8x32xf32>
    %31 = arith.addf %29, %30 : vector<8x32xf32>
    %32 = math.tanh %31 : vector<8x32xf32>
    %33 = arith.mulf %28, %32 : vector<8x32xf32>
    %c0_20 = arith.constant 0 : index
    %c0_21 = arith.constant 0 : index
    %c0_22 = arith.constant 0 : index
    %34 = vector.load %arg9[%c0_20, %c0_21, %c0_22] : memref<8x8x32xf32, #tpu.memory_space<vmem>>, vector<1x8x32xf32>
    %35 = vector.shape_cast %34 : vector<1x8x32xf32> to vector<8x32xf32>
    %36 = vector.shape_cast %33 : vector<8x32xf32> to vector<1x8x32xf32>
    tpu.vector_store %arg9[%c0_20, %c0_21, %c0_22], %36 {strides = array<i32>} : memref<8x8x32xf32, #tpu.memory_space<vmem>>, vector<1x8x32xf32>,
    %c1 = arith.constant 1 : index
    %c0_23 = arith.constant 0 : index
    %c0_24 = arith.constant 0 : index
    %37 = vector.load %arg8[%c1, %c0_23, %c0_24] : memref<8x8x128xf32, #tpu.memory_space<vmem>>, vector<1x8x128xf32>
    %38 = vector.shape_cast %37 : vector<1x8x128xf32> to vector<8x128xf32>
    %cst_25 = arith.constant dense<0.000000e+00> : vector<8x128xf32>
    %39 = tpu.matmul %33, %9, %cst_25 {dimension_numbers = #tpu.dot_dimension_numbers<[1], [0], [0], [1], [0, 0, 1, 1], [], []>} : vector<8x32xf32>, vector<32x128xf32>, vector<8x128xf32> -> vector<8x128xf32>
    %40 = arith.addf %38, %39 : vector<8x128xf32>
    %41 = arith.negf %40 : vector<8x128xf32>
    %42 = math.exp %41 : vector<8x128xf32>
    %cst_26 = arith.constant 1.000000e+00 : f32
    %43 = vector.broadcast %cst_26 : f32 to vector<8x128xf32>
    %44 = arith.addf %43, %42 : vector<8x128xf32>
    %45 = arith.divf %43, %44 : vector<8x128xf32>
    %46 = vector.extract_strided_slice %45 {offsets = [0, 0], sizes = [8, 32], strides = [1, 1]} : vector<8x128xf32> to vector<8x32xf32>
    %47 = vector.extract_strided_slice %45 {offsets = [0, 32], sizes = [8, 32], strides = [1, 1]} : vector<8x128xf32> to vector<8x32xf32>
    %48 = vector.extract_strided_slice %45 {offsets = [0, 64], sizes = [8, 32], strides = [1, 1]} : vector<8x128xf32> to vector<8x32xf32>
    %cst_27 = arith.constant 2.000000e+00 : f32
    %49 = vector.broadcast %cst_27 : f32 to vector<8x32xf32>
    %50 = arith.mulf %49, %48 : vector<8x32xf32>
    %cst_28 = arith.constant 1.000000e+00 : f32
    %51 = vector.broadcast %cst_28 : f32 to vector<8x32xf32>
    %52 = arith.subf %50, %51 : vector<8x32xf32>
    %53 = vector.extract_strided_slice %45 {offsets = [0, 96], sizes = [8, 32], strides = [1, 1]} : vector<8x128xf32> to vector<8x32xf32>
    %54 = arith.mulf %47, %31 : vector<8x32xf32>
    %55 = arith.mulf %46, %52 : vector<8x32xf32>
    %56 = arith.addf %54, %55 : vector<8x32xf32>
    %57 = math.tanh %56 : vector<8x32xf32>
    %58 = arith.mulf %53, %57 : vector<8x32xf32>
    %c1_29 = arith.constant 1 : index
    %c0_30 = arith.constant 0 : index
    %c0_31 = arith.constant 0 : index
    %59 = vector.load %arg9[%c1_29, %c0_30, %c0_31] : memref<8x8x32xf32, #tpu.memory_space<vmem>>, vector<1x8x32xf32>
    %60 = vector.shape_cast %59 : vector<1x8x32xf32> to vector<8x32xf32>
    %61 = vector.shape_cast %58 : vector<8x32xf32> to vector<1x8x32xf32>
    tpu.vector_store %arg9[%c1_29, %c0_30, %c0_31], %61 {strides = array<i32>} : memref<8x8x32xf32, #tpu.memory_space<vmem>>, vector<1x8x32xf32>,
    %c2 = arith.constant 2 : index
    %c0_32 = arith.constant 0 : index
    %c0_33 = arith.constant 0 : index
    %62 = vector.load %arg8[%c2, %c0_32, %c0_33] : memref<8x8x128xf32, #tpu.memory_space<vmem>>, vector<1x8x128xf32>
    %63 = vector.shape_cast %62 : vector<1x8x128xf32> to vector<8x128xf32>
    %cst_34 = arith.constant dense<0.000000e+00> : vector<8x128xf32>
    %64 = tpu.matmul %58, %9, %cst_34 {dimension_numbers = #tpu.dot_dimension_numbers<[1], [0], [0], [1], [0, 0, 1, 1], [], []>} : vector<8x32xf32>, vector<32x128xf32>, vector<8x128xf32> -> vector<8x128xf32>
    %65 = arith.addf %63, %64 : vector<8x128xf32>
    %66 = arith.negf %65 : vector<8x128xf32>
    %67 = math.exp %66 : vector<8x128xf32>
    %cst_35 = arith.constant 1.000000e+00 : f32
    %68 = vector.broadcast %cst_35 : f32 to vector<8x128xf32>
    %69 = arith.addf %68, %67 : vector<8x128xf32>
    %70 = arith.divf %68, %69 : vector<8x128xf32>
    %71 = vector.extract_strided_slice %70 {offsets = [0, 0], sizes = [8, 32], strides = [1, 1]} : vector<8x128xf32> to vector<8x32xf32>
    %72 = vector.extract_strided_slice %70 {offsets = [0, 32], sizes = [8, 32], strides = [1, 1]} : vector<8x128xf32> to vector<8x32xf32>
    %73 = vector.extract_strided_slice %70 {offsets = [0, 64], sizes = [8, 32], strides = [1, 1]} : vector<8x128xf32> to vector<8x32xf32>
    %cst_36 = arith.constant 2.000000e+00 : f32
    %74 = vector.broadcast %cst_36 : f32 to vector<8x32xf32>
    %75 = arith.mulf %74, %73 : vector<8x32xf32>
    %cst_37 = arith.constant 1.000000e+00 : f32
    %76 = vector.broadcast %cst_37 : f32 to vector<8x32xf32>
    %77 = arith.subf %75, %76 : vector<8x32xf32>
    %78 = vector.extract_strided_slice %70 {offsets = [0, 96], sizes = [8, 32], strides = [1, 1]} : vector<8x128xf32> to vector<8x32xf32>
    %79 = arith.mulf %72, %56 : vector<8x32xf32>
    %80 = arith.mulf %71, %77 : vector<8x32xf32>
    %81 = arith.addf %79, %80 : vector<8x32xf32>
    %82 = math.tanh %81 : vector<8x32xf32>
    %83 = arith.mulf %78, %82 : vector<8x32xf32>
    %c2_38 = arith.constant 2 : index
    %c0_39 = arith.constant 0 : index
    %c0_40 = arith.constant 0 : index
    %84 = vector.load %arg9[%c2_38, %c0_39, %c0_40] : memref<8x8x32xf32, #tpu.memory_space<vmem>>, vector<1x8x32xf32>
    %85 = vector.shape_cast %84 : vector<1x8x32xf32> to vector<8x32xf32>
    %86 = vector.shape_cast %83 : vector<8x32xf32> to vector<1x8x32xf32>
    tpu.vector_store %arg9[%c2_38, %c0_39, %c0_40], %86 {strides = array<i32>} : memref<8x8x32xf32, #tpu.memory_space<vmem>>, vector<1x8x32xf32>,
    %c3 = arith.constant 3 : index
    %c0_41 = arith.constant 0 : index
    %c0_42 = arith.constant 0 : index
    %87 = vector.load %arg8[%c3, %c0_41, %c0_42] : memref<8x8x128xf32, #tpu.memory_space<vmem>>, vector<1x8x128xf32>
    %88 = vector.shape_cast %87 : vector<1x8x128xf32> to vector<8x128xf32>
    %cst_43 = arith.constant dense<0.000000e+00> : vector<8x128xf32>
    %89 = tpu.matmul %83, %9, %cst_43 {dimension_numbers = #tpu.dot_dimension_numbers<[1], [0], [0], [1], [0, 0, 1, 1], [], []>} : vector<8x32xf32>, vector<32x128xf32>, vector<8x128xf32> -> vector<8x128xf32>
    %90 = arith.addf %88, %89 : vector<8x128xf32>
    %91 = arith.negf %90 : vector<8x128xf32>
    %92 = math.exp %91 : vector<8x128xf32>
    %cst_44 = arith.constant 1.000000e+00 : f32
    %93 = vector.broadcast %cst_44 : f32 to vector<8x128xf32>
    %94 = arith.addf %93, %92 : vector<8x128xf32>
    %95 = arith.divf %93, %94 : vector<8x128xf32>
    %96 = vector.extract_strided_slice %95 {offsets = [0, 0], sizes = [8, 32], strides = [1, 1]} : vector<8x128xf32> to vector<8x32xf32>
    %97 = vector.extract_strided_slice %95 {offsets = [0, 32], sizes = [8, 32], strides = [1, 1]} : vector<8x128xf32> to vector<8x32xf32>
    %98 = vector.extract_strided_slice %95 {offsets = [0, 64], sizes = [8, 32], strides = [1, 1]} : vector<8x128xf32> to vector<8x32xf32>
    %cst_45 = arith.constant 2.000000e+00 : f32
    %99 = vector.broadcast %cst_45 : f32 to vector<8x32xf32>
    %100 = arith.mulf %99, %98 : vector<8x32xf32>
    %cst_46 = arith.constant 1.000000e+00 : f32
    %101 = vector.broadcast %cst_46 : f32 to vector<8x32xf32>
    %102 = arith.subf %100, %101 : vector<8x32xf32>
    %103 = vector.extract_strided_slice %95 {offsets = [0, 96], sizes = [8, 32], strides = [1, 1]} : vector<8x128xf32> to vector<8x32xf32>
    %104 = arith.mulf %97, %81 : vector<8x32xf32>
    %105 = arith.mulf %96, %102 : vector<8x32xf32>
    %106 = arith.addf %104, %105 : vector<8x32xf32>
    %107 = math.tanh %106 : vector<8x32xf32>
    %108 = arith.mulf %103, %107 : vector<8x32xf32>
    %c3_47 = arith.constant 3 : index
    %c0_48 = arith.constant 0 : index
    %c0_49 = arith.constant 0 : index
    %109 = vector.load %arg9[%c3_47, %c0_48, %c0_49] : memref<8x8x32xf32, #tpu.memory_space<vmem>>, vector<1x8x32xf32>
    %110 = vector.shape_cast %109 : vector<1x8x32xf32> to vector<8x32xf32>
    %111 = vector.shape_cast %108 : vector<8x32xf32> to vector<1x8x32xf32>
    tpu.vector_store %arg9[%c3_47, %c0_48, %c0_49], %111 {strides = array<i32>} : memref<8x8x32xf32, #tpu.memory_space<vmem>>, vector<1x8x32xf32>,
    %c4 = arith.constant 4 : index
    %c0_50 = arith.constant 0 : index
    %c0_51 = arith.constant 0 : index
    %112 = vector.load %arg8[%c4, %c0_50, %c0_51] : memref<8x8x128xf32, #tpu.memory_space<vmem>>, vector<1x8x128xf32>
    %113 = vector.shape_cast %112 : vector<1x8x128xf32> to vector<8x128xf32>
    %cst_52 = arith.constant dense<0.000000e+00> : vector<8x128xf32>
    %114 = tpu.matmul %108, %9, %cst_52 {dimension_numbers = #tpu.dot_dimension_numbers<[1], [0], [0], [1], [0, 0, 1, 1], [], []>} : vector<8x32xf32>, vector<32x128xf32>, vector<8x128xf32> -> vector<8x128xf32>
    %115 = arith.addf %113, %114 : vector<8x128xf32>
    %116 = arith.negf %115 : vector<8x128xf32>
    %117 = math.exp %116 : vector<8x128xf32>
    %cst_53 = arith.constant 1.000000e+00 : f32
    %118 = vector.broadcast %cst_53 : f32 to vector<8x128xf32>
    %119 = arith.addf %118, %117 : vector<8x128xf32>
    %120 = arith.divf %118, %119 : vector<8x128xf32>
    %121 = vector.extract_strided_slice %120 {offsets = [0, 0], sizes = [8, 32], strides = [1, 1]} : vector<8x128xf32> to vector<8x32xf32>
    %122 = vector.extract_strided_slice %120 {offsets = [0, 32], sizes = [8, 32], strides = [1, 1]} : vector<8x128xf32> to vector<8x32xf32>
    %123 = vector.extract_strided_slice %120 {offsets = [0, 64], sizes = [8, 32], strides = [1, 1]} : vector<8x128xf32> to vector<8x32xf32>
    %cst_54 = arith.constant 2.000000e+00 : f32
    %124 = vector.broadcast %cst_54 : f32 to vector<8x32xf32>
    %125 = arith.mulf %124, %123 : vector<8x32xf32>
    %cst_55 = arith.constant 1.000000e+00 : f32
    %126 = vector.broadcast %cst_55 : f32 to vector<8x32xf32>
    %127 = arith.subf %125, %126 : vector<8x32xf32>
    %128 = vector.extract_strided_slice %120 {offsets = [0, 96], sizes = [8, 32], strides = [1, 1]} : vector<8x128xf32> to vector<8x32xf32>
    %129 = arith.mulf %122, %106 : vector<8x32xf32>
    %130 = arith.mulf %121, %127 : vector<8x32xf32>
    %131 = arith.addf %129, %130 : vector<8x32xf32>
    %132 = math.tanh %131 : vector<8x32xf32>
    %133 = arith.mulf %128, %132 : vector<8x32xf32>
    %c4_56 = arith.constant 4 : index
    %c0_57 = arith.constant 0 : index
    %c0_58 = arith.constant 0 : index
    %134 = vector.load %arg9[%c4_56, %c0_57, %c0_58] : memref<8x8x32xf32, #tpu.memory_space<vmem>>, vector<1x8x32xf32>
    %135 = vector.shape_cast %134 : vector<1x8x32xf32> to vector<8x32xf32>
    %136 = vector.shape_cast %133 : vector<8x32xf32> to vector<1x8x32xf32>
    tpu.vector_store %arg9[%c4_56, %c0_57, %c0_58], %136 {strides = array<i32>} : memref<8x8x32xf32, #tpu.memory_space<vmem>>, vector<1x8x32xf32>,
    %c5 = arith.constant 5 : index
    %c0_59 = arith.constant 0 : index
    %c0_60 = arith.constant 0 : index
    %137 = vector.load %arg8[%c5, %c0_59, %c0_60] : memref<8x8x128xf32, #tpu.memory_space<vmem>>, vector<1x8x128xf32>
    %138 = vector.shape_cast %137 : vector<1x8x128xf32> to vector<8x128xf32>
    %cst_61 = arith.constant dense<0.000000e+00> : vector<8x128xf32>
    %139 = tpu.matmul %133, %9, %cst_61 {dimension_numbers = #tpu.dot_dimension_numbers<[1], [0], [0], [1], [0, 0, 1, 1], [], []>} : vector<8x32xf32>, vector<32x128xf32>, vector<8x128xf32> -> vector<8x128xf32>
    %140 = arith.addf %138, %139 : vector<8x128xf32>
    %141 = arith.negf %140 : vector<8x128xf32>
    %142 = math.exp %141 : vector<8x128xf32>
    %cst_62 = arith.constant 1.000000e+00 : f32
    %143 = vector.broadcast %cst_62 : f32 to vector<8x128xf32>
    %144 = arith.addf %143, %142 : vector<8x128xf32>
    %145 = arith.divf %143, %144 : vector<8x128xf32>
    %146 = vector.extract_strided_slice %145 {offsets = [0, 0], sizes = [8, 32], strides = [1, 1]} : vector<8x128xf32> to vector<8x32xf32>
    %147 = vector.extract_strided_slice %145 {offsets = [0, 32], sizes = [8, 32], strides = [1, 1]} : vector<8x128xf32> to vector<8x32xf32>
    %148 = vector.extract_strided_slice %145 {offsets = [0, 64], sizes = [8, 32], strides = [1, 1]} : vector<8x128xf32> to vector<8x32xf32>
    %cst_63 = arith.constant 2.000000e+00 : f32
    %149 = vector.broadcast %cst_63 : f32 to vector<8x32xf32>
    %150 = arith.mulf %149, %148 : vector<8x32xf32>
    %cst_64 = arith.constant 1.000000e+00 : f32
    %151 = vector.broadcast %cst_64 : f32 to vector<8x32xf32>
    %152 = arith.subf %150, %151 : vector<8x32xf32>
    %153 = vector.extract_strided_slice %145 {offsets = [0, 96], sizes = [8, 32], strides = [1, 1]} : vector<8x128xf32> to vector<8x32xf32>
    %154 = arith.mulf %147, %131 : vector<8x32xf32>
    %155 = arith.mulf %146, %152 : vector<8x32xf32>
    %156 = arith.addf %154, %155 : vector<8x32xf32>
    %157 = math.tanh %156 : vector<8x32xf32>
    %158 = arith.mulf %153, %157 : vector<8x32xf32>
    %c5_65 = arith.constant 5 : index
    %c0_66 = arith.constant 0 : index
    %c0_67 = arith.constant 0 : index
    %159 = vector.load %arg9[%c5_65, %c0_66, %c0_67] : memref<8x8x32xf32, #tpu.memory_space<vmem>>, vector<1x8x32xf32>
    %160 = vector.shape_cast %159 : vector<1x8x32xf32> to vector<8x32xf32>
    %161 = vector.shape_cast %158 : vector<8x32xf32> to vector<1x8x32xf32>
    tpu.vector_store %arg9[%c5_65, %c0_66, %c0_67], %161 {strides = array<i32>} : memref<8x8x32xf32, #tpu.memory_space<vmem>>, vector<1x8x32xf32>,
    %c6 = arith.constant 6 : index
    %c0_68 = arith.constant 0 : index
    %c0_69 = arith.constant 0 : index
    %162 = vector.load %arg8[%c6, %c0_68, %c0_69] : memref<8x8x128xf32, #tpu.memory_space<vmem>>, vector<1x8x128xf32>
    %163 = vector.shape_cast %162 : vector<1x8x128xf32> to vector<8x128xf32>
    %cst_70 = arith.constant dense<0.000000e+00> : vector<8x128xf32>
    %164 = tpu.matmul %158, %9, %cst_70 {dimension_numbers = #tpu.dot_dimension_numbers<[1], [0], [0], [1], [0, 0, 1, 1], [], []>} : vector<8x32xf32>, vector<32x128xf32>, vector<8x128xf32> -> vector<8x128xf32>
    %165 = arith.addf %163, %164 : vector<8x128xf32>
    %166 = arith.negf %165 : vector<8x128xf32>
    %167 = math.exp %166 : vector<8x128xf32>
    %cst_71 = arith.constant 1.000000e+00 : f32
    %168 = vector.broadcast %cst_71 : f32 to vector<8x128xf32>
    %169 = arith.addf %168, %167 : vector<8x128xf32>
    %170 = arith.divf %168, %169 : vector<8x128xf32>
    %171 = vector.extract_strided_slice %170 {offsets = [0, 0], sizes = [8, 32], strides = [1, 1]} : vector<8x128xf32> to vector<8x32xf32>
    %172 = vector.extract_strided_slice %170 {offsets = [0, 32], sizes = [8, 32], strides = [1, 1]} : vector<8x128xf32> to vector<8x32xf32>
    %173 = vector.extract_strided_slice %170 {offsets = [0, 64], sizes = [8, 32], strides = [1, 1]} : vector<8x128xf32> to vector<8x32xf32>
    %cst_72 = arith.constant 2.000000e+00 : f32
    %174 = vector.broadcast %cst_72 : f32 to vector<8x32xf32>
    %175 = arith.mulf %174, %173 : vector<8x32xf32>
    %cst_73 = arith.constant 1.000000e+00 : f32
    %176 = vector.broadcast %cst_73 : f32 to vector<8x32xf32>
    %177 = arith.subf %175, %176 : vector<8x32xf32>
    %178 = vector.extract_strided_slice %170 {offsets = [0, 96], sizes = [8, 32], strides = [1, 1]} : vector<8x128xf32> to vector<8x32xf32>
    %179 = arith.mulf %172, %156 : vector<8x32xf32>
    %180 = arith.mulf %171, %177 : vector<8x32xf32>
    %181 = arith.addf %179, %180 : vector<8x32xf32>
    %182 = math.tanh %181 : vector<8x32xf32>
    %183 = arith.mulf %178, %182 : vector<8x32xf32>
    %c6_74 = arith.constant 6 : index
    %c0_75 = arith.constant 0 : index
    %c0_76 = arith.constant 0 : index
    %184 = vector.load %arg9[%c6_74, %c0_75, %c0_76] : memref<8x8x32xf32, #tpu.memory_space<vmem>>, vector<1x8x32xf32>
    %185 = vector.shape_cast %184 : vector<1x8x32xf32> to vector<8x32xf32>
    %186 = vector.shape_cast %183 : vector<8x32xf32> to vector<1x8x32xf32>
    tpu.vector_store %arg9[%c6_74, %c0_75, %c0_76], %186 {strides = array<i32>} : memref<8x8x32xf32, #tpu.memory_space<vmem>>, vector<1x8x32xf32>,
    %c7 = arith.constant 7 : index
    %c0_77 = arith.constant 0 : index
    %c0_78 = arith.constant 0 : index
    %187 = vector.load %arg8[%c7, %c0_77, %c0_78] : memref<8x8x128xf32, #tpu.memory_space<vmem>>, vector<1x8x128xf32>
    %188 = vector.shape_cast %187 : vector<1x8x128xf32> to vector<8x128xf32>
    %cst_79 = arith.constant dense<0.000000e+00> : vector<8x128xf32>
    %189 = tpu.matmul %183, %9, %cst_79 {dimension_numbers = #tpu.dot_dimension_numbers<[1], [0], [0], [1], [0, 0, 1, 1], [], []>} : vector<8x32xf32>, vector<32x128xf32>, vector<8x128xf32> -> vector<8x128xf32>
    %190 = arith.addf %188, %189 : vector<8x128xf32>
    %191 = arith.negf %190 : vector<8x128xf32>
    %192 = math.exp %191 : vector<8x128xf32>
    %cst_80 = arith.constant 1.000000e+00 : f32
    %193 = vector.broadcast %cst_80 : f32 to vector<8x128xf32>
    %194 = arith.addf %193, %192 : vector<8x128xf32>
    %195 = arith.divf %193, %194 : vector<8x128xf32>
    %196 = vector.extract_strided_slice %195 {offsets = [0, 0], sizes = [8, 32], strides = [1, 1]} : vector<8x128xf32> to vector<8x32xf32>
    %197 = vector.extract_strided_slice %195 {offsets = [0, 32], sizes = [8, 32], strides = [1, 1]} : vector<8x128xf32> to vector<8x32xf32>
    %198 = vector.extract_strided_slice %195 {offsets = [0, 64], sizes = [8, 32], strides = [1, 1]} : vector<8x128xf32> to vector<8x32xf32>
    %cst_81 = arith.constant 2.000000e+00 : f32
    %199 = vector.broadcast %cst_81 : f32 to vector<8x32xf32>
    %200 = arith.mulf %199, %198 : vector<8x32xf32>
    %cst_82 = arith.constant 1.000000e+00 : f32
    %201 = vector.broadcast %cst_82 : f32 to vector<8x32xf32>
    %202 = arith.subf %200, %201 : vector<8x32xf32>
    %203 = vector.extract_strided_slice %195 {offsets = [0, 96], sizes = [8, 32], strides = [1, 1]} : vector<8x128xf32> to vector<8x32xf32>
    %204 = arith.mulf %197, %181 : vector<8x32xf32>
    %205 = arith.mulf %196, %202 : vector<8x32xf32>
    %206 = arith.addf %204, %205 : vector<8x32xf32>
    %207 = math.tanh %206 : vector<8x32xf32>
    %208 = arith.mulf %203, %207 : vector<8x32xf32>
    %c7_83 = arith.constant 7 : index
    %c0_84 = arith.constant 0 : index
    %c0_85 = arith.constant 0 : index
    %209 = vector.load %arg9[%c7_83, %c0_84, %c0_85] : memref<8x8x32xf32, #tpu.memory_space<vmem>>, vector<1x8x32xf32>
    %210 = vector.shape_cast %209 : vector<1x8x32xf32> to vector<8x32xf32>
    %211 = vector.shape_cast %208 : vector<8x32xf32> to vector<1x8x32xf32>
    tpu.vector_store %arg9[%c7_83, %c0_84, %c0_85], %211 {strides = array<i32>} : memref<8x8x32xf32, #tpu.memory_space<vmem>>, vector<1x8x32xf32>,
    %c0_86 = arith.constant 0 : index
    %c0_87 = arith.constant 0 : index
    %c0_88 = arith.constant 0 : index
    %212 = vector.load %arg9[%c0_86, %c0_87, %c0_88] : memref<8x8x32xf32, #tpu.memory_space<vmem>>, vector<8x8x32xf32>
    %213 = vector.shape_cast %212 : vector<8x8x32xf32> to vector<64x32xf32>
    %c0_89 = arith.constant 0 : index
    %c0_90 = arith.constant 0 : index
    %214 = vector.load %arg5[%c0_89, %c0_90] : memref<32x8xf32, #tpu.memory_space<vmem>>, vector<32x8xf32>
    %cst_91 = arith.constant dense<0.000000e+00> : vector<64x8xf32>
    %215 = tpu.matmul %213, %214, %cst_91 {dimension_numbers = #tpu.dot_dimension_numbers<[1], [0], [0], [1], [0, 0, 1, 1], [], []>} : vector<64x32xf32>, vector<32x8xf32>, vector<64x8xf32> -> vector<64x8xf32>
    %c0_92 = arith.constant 0 : index
    %c0_93 = arith.constant 0 : index
    %216 = vector.load %arg6[%c0_92, %c0_93] : memref<1x8xf32, #tpu.memory_space<vmem>>, vector<1x8xf32>
    %217 = vector.broadcast %216 : vector<1x8xf32> to vector<64x8xf32>
    %218 = arith.addf %215, %217 : vector<64x8xf32>
    %219 = tpu.iota {dimensions = array<i32: 1>} : vector<64x8xi32>
    %c2_i32 = arith.constant 2 : i32
    %220 = vector.broadcast %c2_i32 : i32 to vector<64x8xi32>
    %221 = arith.cmpi slt, %219, %220 : vector<64x8xi32>
    %c4_i32 = arith.constant 4 : i32
    %222 = vector.broadcast %c4_i32 : i32 to vector<64x8xi32>
    %223 = arith.cmpi slt, %219, %222 : vector<64x8xi32>
    %224 = math.exp %218 : vector<64x8xf32>
    %225 = math.tanh %218 : vector<64x8xf32>
    %226 = arith.select %223, %224, %225 : vector<64x8xi1>, vector<64x8xf32>
    %227 = arith.select %221, %218, %226 : vector<64x8xi1>, vector<64x8xf32>
    %228 = vector.shape_cast %227 : vector<64x8xf32> to vector<8x8x8xf32>
    %c0_94 = arith.constant 0 : index
    %c0_95 = arith.constant 0 : index
    %c0_96 = arith.constant 0 : index
    %229 = vector.load %arg7[%c0_94, %c0_95, %c0_96] : memref<8x8x8xf32, #tpu.memory_space<vmem>>, vector<8x8x8xf32>
    tpu.vector_store %arg7[%c0_94, %c0_95, %c0_96], %228 {strides = array<i32>} : memref<8x8x8xf32, #tpu.memory_space<vmem>>, vector<8x8x8xf32>,
    return
  }
  func.func @transform_0(%arg0: i32) -> (i32, i32, i32) {
    %c0_i32 = arith.constant 0 : i32
    %c0_i32_0 = arith.constant 0 : i32
    %c0_i32_1 = arith.constant 0 : i32
    return %c0_i32, %arg0, %c0_i32_0 : i32, i32, i32
  }
  func.func @transform_1(%arg0: i32) -> (i32, i32) {
    %c0_i32 = arith.constant 0 : i32
    %c0_i32_0 = arith.constant 0 : i32
    %c0_i32_1 = arith.constant 0 : i32
    return %c0_i32, %c0_i32_0 : i32, i32
  }
  func.func @transform_2(%arg0: i32) -> (i32, i32) {
    %c0_i32 = arith.constant 0 : i32
    %c0_i32_0 = arith.constant 0 : i32
    %c0_i32_1 = arith.constant 0 : i32
    return %c0_i32, %c0_i32_0 : i32, i32
  }
  func.func @transform_3(%arg0: i32) -> (i32, i32) {
    %c0_i32 = arith.constant 0 : i32
    %c0_i32_0 = arith.constant 0 : i32
    %c0_i32_1 = arith.constant 0 : i32
    return %c0_i32, %c0_i32_0 : i32, i32
  }
  func.func @transform_4(%arg0: i32) -> (i32, i32) {
    %c0_i32 = arith.constant 0 : i32
    %c0_i32_0 = arith.constant 0 : i32
    %c0_i32_1 = arith.constant 0 : i32
    return %c0_i32, %c0_i32_0 : i32, i32
  }
  func.func @transform_5(%arg0: i32) -> (i32, i32) {
    %c0_i32 = arith.constant 0 : i32
    %c0_i32_0 = arith.constant 0 : i32
    %c0_i32_1 = arith.constant 0 : i32
    return %c0_i32, %c0_i32_0 : i32, i32
  }
  func.func @transform_6(%arg0: i32) -> (i32, i32, i32) {
    %c0_i32 = arith.constant 0 : i32
    %c0_i32_0 = arith.constant 0 : i32
    %c0_i32_1 = arith.constant 0 : i32
    return %c0_i32, %arg0, %c0_i32_0 : i32, i32, i32
  }
}

</mosaic_0001>

<bundles_post_ra>
// kernel: tpu_custom_call.1
= control target key start
LH: loop header
LB: loop body
LE: loop exit
PB: predicated region body
PF: predicated region fallthrough
CT: control target
= control target key end

     0   :  { %11 = vsyncpa [#allocation5], 0  ;;  %s2599_s0 = inlined_call_operand.hbm [shape: f32[8,16,37], index: 0, kind: input, shape index: {}]   ;;  %s2600_s1 = inlined_call_operand.vmem [shape: f32[37,128], index: 1, kind: input, shape index: {}]   ;;  %s2601_s2 = inlined_call_operand.vmem [shape: f32[1,128], index: 2, kind: input, shape index: {}]   ;;  %s2602_s3 = inlined_call_operand.hbm [shape: f32[32,128], index: 3, kind: input, shape index: {}]   ;;  %s2603_s4 = inlined_call_operand.vmem [shape: f32[32,8], index: 4, kind: input, shape index: {}]   ;;  %s2604_s5 = inlined_call_operand.vmem [shape: f32[1,8], index: 5, kind: input, shape index: {}]   ;;  %s2605_s6 = inlined_call_operand.vmem [shape: f32[8,16,8], index: 6, kind: output, shape index: {}]  }
   0x1   :  { %13 = vsyncpa [#allocation5 + $0x1], 0 }
   0x2   :  { %14 = vsyncpa [#allocation7], 0  ;;  %s2163_s21 = smov 0   ;;  %s2165_s22 = smov 0  }
   0x3   :  { %s2167_s23 = smov 0   ;;  %s2169_s24 = smov 0  }
   0x4 LB: > { %s2182_s25 = sadd.s32 4294967295, %s2117_s24   ;;  %s2185_s26 = sadd.s32 1, %s2117_s24   ;;  %s2117_s24 = sphi %s2169_s24, %s2623_s24   ;;  %s2113_s23 = sphi %s2167_s23, %s2622_s23   ;;  %s2109_s22 = sphi %s2165_s22, %s2621_s22   ;;  %s2105_s21 = sphi %s2163_s21, %s2620_s21  }
   0x5   : > { %s24_s27 = ssub.s32 %s2117_s24, %s2185_s26  ;;  %s27_s28 = sadd.s32 1, %s2113_s23 }
   0x6   : > { %p25_p0 = scmp.eq.s32.totalorder %s24_s27, 0  ;;  %p34_p1 = scmp.ne.s32.totalorder %s2113_s23, %s2109_s22 }
   0x7   : > { %p35_p2 = scmp.eq.s32.totalorder %s2117_s24, 0  ;;  %p40_p3 = scmp.ne.s32.totalorder %s2109_s22, %s2105_s21 }
   0x8   : > { %s2195_s29 = scalar_select %p25_p0, %s2113_s23, %s27_s28  }
   0x9   : > { %p2197_p4 = por %p35_p2, %p34_p1  ;;  %p2606_p5 = scmp.eq.s32.totalorder %s2182_s25, 0 }
   0xa   : > { %p169_p6 = scmp.eq.s32.totalorder %s2182_s25, 1  ;;  %p1638_p7 = scmp.ge.s32.totalorder %s2117_s24, 1 }
   0xb   : > { %p2206_p8 = por %p2606_p5, %p40_p3  ;;  %p182_p9 = scmp.lt.s32.totalorder %s2117_s24, 3 }
   0xc   : > { %p2211_p10 = por %p169_p6, %p34_p1  ;;  %s2119_s10 = smov [#allocation6]  }
   0xd   : > { %s2610_s7 = scalar_select %p2206_p8, 1, 0 }
   0xe   : > { %s2611_s8 = scalar_select %p2211_p10, 1, 0 }
   0xf   : > { %p2215_p11 = pnand %p1638_p7, %p182_p9  ;;  %s200_s11 = sshll.u32 %s2119_s10, 4  ;;  %s201_s11 = int_to_ptr.vmem [resolvable:$true] %s200_s11 }
  0x10   : > { %p1903_p0 = scmp.lt.s32.totalorder %s2117_s24, 2  ;;  %s220_s13 = sand.u32 1, %s2113_s23  }
  0x11   : > { %s2612_s9 = scalar_select %p2215_p11, 1, 0 }
  0x12   : > { %p1894_p12 = pneg %p2215_p11  ;;  %s1642_s14 = sshll.u32 %s2117_s24, 7 }
  0x13   : > { %p2232_p1 = pnand %p1903_p0, %p2197_p4  ;;  %s2036_s16 = scalar_lea.vmem %s201_s11, 512 }
  0x14   : > { %p2223_p13 = pnand %p1894_p12, %p2606_p5  ;;  %p2037_p3 = scmp.ne.s32.totalorder %s201_s11, %s2036_s16 }
  0x15   : > { %p2044_p9 = scmp.lt.s32.totalorder %s201_s11, %s201_s11  ;;  %p2045_p12 = scmp.lt.s32.totalorder %s2036_s16, %s2036_s16 }
  0x16   : > { %p2027_p2 = pneg %p2223_p13 }
  0x17   : > { %p2046_p5 = por %p2045_p12, %p2044_p9 }
  0x18   : > { %p2039_p6 = pnand %p2037_p3, %p2027_p2 }
  0x1a   : > { %p2040_p7 = pneg %p2039_p6 }
  0x1c   : > { %p2047_p10 = pnand %p2046_p5, %p2040_p7 }
  0x1e   : > { %2050 = shalt.err (!%p2047_p10)
}
  0x1f   : > { %s2120_s17 = smov 128   ;;  %s2121_s18 = smov 8  }
  0x20   : > { %1897 = dma.hbm_to_vmem [thread:$0]  (!%p2223_p13), %s2602_s3, 512, %s201_s11, [#allocation7], %s2120_s17, %s2120_s17, %s2121_s18  }
  0x21   : > { %s1641_s21 = sshll.u32 %s220_s13, 6  ;;  %s2249_s28 = scalar_lea.hbm %s2599_s0, %s1642_s14 }
  0x22   : > { %s224_s30 = scalar_lea.vmem [#allocation4], %s1641_s21  ;;  %s2253_s12 = scalar_lea.sflag [#allocation5], %s220_s13 }
  0x23   : > { %s230_s10 = sshll.u32 %s224_s30, 4  ;;  %s2051_s16 = scalar_lea.hbm %s2249_s28, 1024  ;;  %s2251_s10 = int_to_ptr.vmem [resolvable:$true] %s230_s10 }
  0x24   : > { %p2052_p4 = scmp.ne.s32.totalorder %s2249_s28, %s2051_s16  ;;  %p2053_p5 = pneg %p2232_p1 }
  0x25   : > { %s2056_s14 = scalar_lea.hbm %s2599_s0, 2048  ;;  %p2057_p0 = scmp.lt.s32.totalorder %s2249_s28, %s2599_s0 }
  0x26   : > { %p2054_p10 = pnand %p2053_p5, %p2052_p4  ;;  %p2058_p2 = scmp.lt.s32.totalorder %s2056_s14, %s2051_s16 }
  0x28   : > { %p2055_p13 = pneg %p2054_p10  ;;  %p2059_p3 = por %p2058_p2, %p2057_p0 }
  0x2a   : > { %p2060_p6 = pnand %p2059_p3, %p2055_p13 }
  0x2c   : > { %2063 = shalt.err (!%p2060_p6)
}
  0x2d   : > { %s2064_s13 = scalar_lea.vmem %s2251_s10, 1024  ;;  %s2122_s21 = smov [#allocation4]  }
  0x2e   : > { %p2065_p7 = scmp.ne.s32.totalorder %s2251_s10, %s2064_s13  ;;  %s2069_s27 = sshll.u32 %s2122_s21, 4  ;;  %s2070_s27 = int_to_ptr.vmem [resolvable:$false] %s2069_s27 }
  0x2f   : > { %s2071_s30 = scalar_lea.vmem %s2070_s27, 2048  ;;  %p2072_p4 = scmp.lt.s32.totalorder %s2251_s10, %s2070_s27 }
  0x30   : > { %p2067_p9 = pnand %p2065_p7, %p2053_p5  ;;  %p2073_p10 = scmp.lt.s32.totalorder %s2071_s30, %s2064_s13 }
  0x32   : > { %p2068_p12 = pneg %p2067_p9  ;;  %p2074_p8 = por %p2073_p10, %p2072_p4 }
  0x34   : > { %p2075_p11 = pnand %p2074_p8, %p2068_p12 }
  0x36   : > { %2078 = shalt.err (!%p2075_p11)
}
  0x37   : > { %s2123_s16 = smov 256   ;;  %p2615_p5 = scmp.ne.s32.totalorder %s2612_s9, 0 }
  0x38   : > { %1901 = dma.hbm_to_vmem [thread:$0]  (!%p2232_p1), %s2249_s28, 1024, %s2251_s10, %s2253_s12, %s2123_s16, %s2120_s17, %s2121_s18  }
  0x39   : > { %242 = sbr.rel (%p2615_p5) target bundleno = 6014 (0x177e), region = 44  ;;  %s244_s11 = sand.u32 (!%p2615_p5), 1, %s2109_s22  }
  0x3a   : > { %s2279_s19 = sshll.u32 (!%p2615_p5), %s244_s11, 6  ;;  %s245_s14 = scalar_lea.sflag (!%p2615_p5), [#allocation5], %s244_s11 }
  0x3b   : > { %s2282_s20 = scalar_lea.vmem (!%p2615_p5), [#allocation4], %s2279_s19  ;;  %p2616_p8 = scmp.ne.s32.totalorder (!%p2615_p5), %s2610_s7, 0 }
  0x3e   : > { %2096 = dma.done.wait (%p2616_p8), %s245_s14, 1024  }
  0x3f   : > { %2098 = vsyncadd (%p2616_p8), %s245_s14, 4294966272  ;;  %p2617_p11 = scmp.eq.s32.totalorder %s2182_s25, 0 }
  0x41   : > { %2100 = dma.done.wait (%p2617_p11), [#allocation7], 512   ;;  %p2618_p1 = pmov %p2617_p11 }
  0x42   : > { %v2124_v0 = vmov 0.0   ;;  %vm2125_vm0 = vmmov 0   ;;  %vm325_vm1 = vcmask 1044480   ;;  %vm300_vm2 = vcmask 302080   ;;  %v292_v1 = vld [vmem:[%s2600_s1 + $0x20] sm:$0x1f] }
  0x43   : > { %2102 = vsyncadd (%p2618_p1), [#allocation7], 4294966784  ;;  %1791 = vmatprep.subr.mxu1 %v2124_v0  ;;  %1799 = vmatprep.mubr.msk.f32.mxu1 %vm2125_vm0, %v2124_v0  ;;  %v291_v2 = vld [vmem:[%s2600_s1 + $0x18] sm:$0xff]  ;;  %v280_v3 = vld [vmem:[%s2282_s20] sm:$0xff]  ;;  %s2126_s30 = smov 64   ;;  %s2127_s16 = smov 32  }
  0x44   : > { %1758 = vmatprep.subr.msk.mxu0 %vm325_vm1, %v292_v1  ;;  %v290_v4 = vld [vmem:[%s2600_s1 + $0x10] sm:$0xff]  ;;  %1768 = vmatprep.mubr.msk.f32.mxu0 %vm300_vm2, %v280_v3  ;;  %v2306_v5 = vld [vmem:[#allocation6 + $0x18] sm:$0xff]  ;;  %v289_v6 = vld [vmem:[%s2600_s1 + $0x8] sm:$0xff]  ;;  %vm447_vm3 = vcmask 261120   ;;  %vm1486_vm6 = vcmask 64512   ;;  %s2509_s12 = scalar_lea.vmem [#allocation8], %s2279_s19 }
  0x45   : > { %1759 = vmatpush3.msk.msra.mxu0 %vm325_vm1, %v292_v1  ;;  %1792 = vmatpush3.msra.mxu1 %v2306_v5  ;;  %v2312_v7 = vld [vmem:[#allocation6 + $0x10] sm:$0xff]  ;;  %v288_v8 = vld [vmem:[%s2600_s1] sm:$0xff]  ;;  %v2319_v9 = vld [vmem:[#allocation6 + $0x8] sm:$0xff]  ;;  %p2619_p13 = scmp.ne.s32.totalorder %s2611_s8, 0 }
  0x46   : > { %1760 = vmatprep.subr.mxu0 %v291_v2  ;;  %1793 = vmatprep.subr.mxu1 %v2124_v0  ;;  %v281_v10 = vld [vmem:[%s2282_s20 + $0x8] sm:$0xff]  ;;  %v2324_v11 = vld [vmem:[#allocation6] sm:$0xff]  ;;  %v282_v12 = vld [vmem:[%s2282_s20 + $0x10] sm:$0xff]  ;;  %s1690_s19 = sshll.u32 (%p2619_p13), %s2182_s25, 3 }
  0x47   : > { %1761 = vmatpush3.msra.mxu0 %v291_v2  ;;  %1794 = vmatpush3.msra.mxu1 %v2312_v7  ;;  %v283_v13 = vld [vmem:[%s2282_s20 + $0x18] sm:$0xff]  ;;  %v284_v14 = vld [vmem:[%s2282_s20 + $0x20] sm:$0xff]  ;;  %v285_v15 = vld [vmem:[%s2282_s20 + $0x28] sm:$0xff]  ;;  %s1503_s21 = scalar_lea.vmem (%p2619_p13), %s2605_s6, %s1690_s19 }
  0x48   : > { %1762 = vmatprep.subr.mxu0 %v290_v4  ;;  %1795 = vmatprep.subr.mxu1 %v2124_v0  ;;  %v286_v16 = vld [vmem:[%s2282_s20 + $0x30] sm:$0xff]  ;;  %v287_v17 = vld [vmem:[%s2282_s20 + $0x38] sm:$0xff]  ;;  %v1647_v18 = vld [vmem:[%s2601_s2] ss:$0 sm:$0xff] }
  0x49   : > { %1763 = vmatpush3.msra.mxu0 %v290_v4  ;;  %1796 = vmatpush3.msra.mxu1 %v2319_v9 }
  0x4a   : > { %1764 = vmatprep.subr.mxu0 %v289_v6  ;;  %1797 = vmatprep.subr.mxu1 %v2124_v0 }
  0x4b   : > { %1765 = vmatpush3.msra.mxu0 %v289_v6  ;;  %1798 = vmatpush3.msra.mxu1 %v2324_v11 }
  0x4c   : > { %1766 = vmatprep.subr.mxu0 %v288_v8  ;;  %1802 = vmatprep.subr.mxu1 %v2124_v0 }
  0x4d   : > { %1767 = vmatpush3.msra.mxu0 %v288_v8 }
  0x4e   : > { %1769 = vmatmul.mubr.msk.f32.vlgmr.msra.gmra.mxu0 %vm300_vm2, %v281_v10  ;;  %1780 = vmatprep.subr.mxu0 %v2124_v0 }
  0x4f   : > { %1781 = vmatpush3.msra.mxu0 %v2306_v5  ;;  %1771 = vmatprep.mubr.msk.f32.mxu0 %vm300_vm2, %v282_v12 }
  0x50   : > { %1782 = vmatprep.subr.mxu0 %v2124_v0 }
  0x51   : > { %1783 = vmatpush3.msra.mxu0 %v2312_v7 }
  0x52   : > { %1772 = vmatmul.mubr.msk.f32.gmra.mxu0 %vm300_vm2, %v283_v13  ;;  %1784 = vmatprep.subr.mxu0 %v2124_v0 }
  0x53   : > { %1774 = vmatprep.mubr.msk.f32.mxu0 %vm300_vm2, %v284_v14  ;;  %1785 = vmatpush3.msra.mxu0 %v2319_v9 }
  0x54   : > { %1786 = vmatprep.subr.mxu0 %v2124_v0 }
  0x55   : > { %1787 = vmatpush3.msra.mxu0 %v2324_v11 }
  0x56   : > { %1775 = vmatmul.mubr.msk.f32.gmra.mxu0 %vm300_vm2, %v285_v15  ;;  %1813 = vmatprep.subr.mxu0 %v2124_v0 }
  0x57   : > { %1777 = vmatprep.mubr.msk.f32.mxu0 %vm300_vm2, %v286_v16 }
  0x5a   : > { %1778 = vmatmul.mubr.msk.f32.gmra.mxu0 %vm300_vm2, %v287_v17 }
  0x5b   : > { %1788 = vmatprep.mubr.msk.f32.mxu0 %vm2125_vm0, %v2124_v0 }
  0x5e   : > { %1789 = vmatmul.mubr.f32.vlgmr.msra.gmra.mxu0 %v2124_v0 }
  0x5f   : > { %1814 = vmatpush3.msra.mxu0 %v2306_v5  ;;  %1821 = vmatprep.mubr.msk.f32.mxu0 %vm2125_vm0, %v2124_v0 }
  0x60   : > { %1815 = vmatprep.subr.mxu0 %v2124_v0 }
  0x61   : > { %1816 = vmatpush3.msra.mxu0 %v2312_v7 }
  0x62   : > { %1817 = vmatprep.subr.mxu0 %v2124_v0 }
  0x63   : > { %1818 = vmatpush3.msra.mxu0 %v2319_v9 }
  0x64   : > { %1819 = vmatprep.subr.mxu0 %v2124_v0 }
  0x65   : > { %1820 = vmatpush3.msra.mxu0 %v2324_v11 }
  0x66   : > { %1835 = vmatprep.subr.mxu0 %v2124_v0 }
 0x10e   : > { %v1770_v19 = vpop.f32.mrf.mxu0 }
 0x10f   : > { %v401_v20 = vadd.f32 %v1770_v19, %v1647_v18 }
 0x110   : > { %v395_v21 = vpop.f32.mrf.mxu0 }
 0x111   : > { %v396_v33 = vadd.f32 %v1647_v18, %v395_v21 }
 0x112   : > { %v1773_v22 = vpop.f32.mrf.mxu0 }
 0x113   : > { %v2367_v23 = vadd.f32 %v1773_v22, %v1647_v18 }
 0x114   : > { %v405_v24 = vpop.f32.mrf.mxu0 }
 0x115   : > { %v2369_v25 = vadd.f32 %v1647_v18, %v405_v24 }
 0x116   : > { %v1776_v26 = vpop.f32.mrf.mxu0 }
 0x117   : > { %v2371_v27 = vadd.f32 %v1776_v26, %v1647_v18 }
 0x118   : > { %v415_v28 = vpop.f32.mrf.mxu0 }
 0x119   : > { %v2373_v29 = vadd.f32 %v1647_v18, %v415_v28 }
 0x11a   : > { %v1779_v30 = vpop.f32.mrf.mxu0 }
 0x11b   : > { %v2375_v31 = vadd.f32 %v1779_v30, %v1647_v18 }
 0x11c   : > { %v425_v32 = vpop.f32.mrf.mxu0 }
 0x11d   : > { %v2377_v34 = vadd.f32 %v1647_v18, %v425_v32 }
 0x11e   : > { %v517_v35 = vpop.f32.mrf.mxu0 }
 0x11f   : > { %v521_v36 = vadd.f32 %v517_v35, %v396_v33 }
 0x120   : > { %v1790_v37 = vpop.f32.mrf.mxu0 }
 0x121   : > { %v1657_v38 = vmul.f32 -1.442695, %v521_v36 }
 0x123   : > { %1945 = vpow2.f32 %v1657_v38 }
 0x130   : > { %v1946_v39 = vpop.eup %1945 }
 0x131   : > { %v525_v40 = vadd.f32 1.0, %v1946_v39 }
 0x133   : > { %1947 = vrcp.f32 %v525_v40 }
 0x140   : > { %v1948_v41 = vpop.eup %1947 }
 0x141   : > { %v528_v42 = vmul.f32 2.0, %v1948_v41  ;;  %v530_v46 = vmul.f32 0.0, %v1948_v41 }
 0x143   : > { %v1658_v43 = vadd.f32 -1.0, %v528_v42 }
 0x145   : > { %532 = vrot.lane.b32.xlu0 %v1658_v43, %s2126_s30 }
 0x1b7   : > { %v533_v44 = vpop.permute.xlu0 %532 }
 0x1b8   : > { %v535_v45 = vmul.f32 %v1948_v41, %v533_v44 }
 0x1ba   : > { %537 = vrot.lane.b32.xlu0 %v535_v45, %s2127_s16 }
 0x22c   : > { %v538_v47 = vpop.permute.xlu0 %537 }
 0x22d   : > { %v540_v48 = vadd.f32 %v538_v47, %v530_v46 }
 0x22f   : > { %1949 = vtanh.f32 %v540_v48 }
 0x23c   : > { %v1950_v49 = vpop.eup %1949 }
 0x23d   : > { %543 = vrot.lane.b32.xlu1 %v1950_v49, %s2126_s30 }
 0x2af   : > { %v544_v50 = vpop.permute.xlu1 %543 }
 0x2b0   : > { %v546_v51 = vmul.f32 %v1948_v41, %v544_v50 }
 0x2b2   : > { %548 = vrot.lane.b32.xlu1 %v546_v51, %s2127_s16 }
 0x324   : > { %v549_v52 = vpop.permute.xlu1 %548 }
 0x325   : > { %551 = vst.msk [vmem:[#allocation3] sm:$0xff] %vm447_vm3, %v549_v52  ;;  %1800 = vmatmul.mubr.msk.f32.vlgmr.msra.gmra.mxu1 %vm447_vm3, %v549_v52 }
 0x326   : > { %1803 = vmatpush3.msra.mxu1 %v2306_v5  ;;  %1810 = vmatprep.mubr.msk.f32.mxu1 %vm2125_vm0, %v2124_v0 }
 0x327   : > { %1804 = vmatprep.subr.mxu1 %v2124_v0 }
 0x328   : > { %1805 = vmatpush3.msra.mxu1 %v2312_v7 }
 0x329   : > { %1806 = vmatprep.subr.mxu1 %v2124_v0 }
 0x32a   : > { %1807 = vmatpush3.msra.mxu1 %v2319_v9 }
 0x32b   : > { %1808 = vmatprep.subr.mxu1 %v2124_v0 }
 0x32c   : > { %1809 = vmatpush3.msra.mxu1 %v2324_v11 }
 0x32d   : > { %1824 = vmatprep.subr.mxu1 %v2124_v0 }
 0x3e5   : > { %v622_v53 = vpop.f32.mrf.mxu1 }
 0x3e6   : > { %v626_v54 = vadd.f32 %v622_v53, %v401_v20 }
 0x3e7   : > { %v1801_v55 = vpop.f32.mrf.mxu1 }
 0x3e8   : > { %v1660_v56 = vmul.f32 -1.442695, %v626_v54 }
 0x3ea   : > { %1951 = vpow2.f32 %v1660_v56 }
 0x3f7   : > { %v1952_v57 = vpop.eup %1951 }
 0x3f8   : > { %v630_v58 = vadd.f32 1.0, %v1952_v57 }
 0x3fa   : > { %1953 = vrcp.f32 %v630_v58 }
 0x407   : > { %v1954_v59 = vpop.eup %1953 }
 0x408   : > { %v633_v60 = vmul.f32 2.0, %v1954_v59  ;;  %v635_v1 = vmul.f32 %v1954_v59, %v540_v48 }
 0x40a   : > { %v1661_v61 = vadd.f32 -1.0, %v633_v60 }
 0x40c   : > { %637 = vrot.lane.b32.xlu0 %v1661_v61, %s2126_s30 }
 0x47e   : > { %v638_v62 = vpop.permute.xlu0 %637 }
 0x47f   : > { %v640_v63 = vmul.f32 %v1954_v59, %v638_v62 }
 0x481   : > { %642 = vrot.lane.b32.xlu1 %v640_v63, %s2127_s16 }
 0x4f3   : > { %v643_v2 = vpop.permute.xlu1 %642 }
 0x4f4   : > { %v645_v3 = vadd.f32 %v643_v2, %v635_v1 }
 0x4f6   : > { %1955 = vtanh.f32 %v645_v3 }
 0x503   : > { %v1956_v4 = vpop.eup %1955 }
 0x504   : > { %648 = vrot.lane.b32.xlu0 %v1956_v4, %s2126_s30 }
 0x576   : > { %v649_v6 = vpop.permute.xlu0 %648 }
 0x577   : > { %v651_v8 = vmul.f32 %v1954_v59, %v649_v6 }
 0x579   : > { %653 = vrot.lane.b32.xlu1 %v651_v8, %s2127_s16 }
 0x5eb   : > { %v654_v10 = vpop.permute.xlu1 %653 }
 0x5ec   : > { %657 = vst.msk [vmem:[#allocation3 + $0x8] sm:$0xff] %vm447_vm3, %v654_v10  ;;  %1811 = vmatmul.mubr.msk.f32.vlgmr.msra.gmra.mxu1 %vm447_vm3, %v654_v10 }
 0x5ed   : > { %1825 = vmatpush3.msra.mxu1 %v2306_v5  ;;  %1832 = vmatprep.mubr.msk.f32.mxu1 %vm2125_vm0, %v2124_v0 }
 0x5ee   : > { %1826 = vmatprep.subr.mxu1 %v2124_v0 }
 0x5ef   : > { %1827 = vmatpush3.msra.mxu1 %v2312_v7 }
 0x5f0   : > { %1828 = vmatprep.subr.mxu1 %v2124_v0 }
 0x5f1   : > { %1829 = vmatpush3.msra.mxu1 %v2319_v9 }
 0x5f2   : > { %1830 = vmatprep.subr.mxu1 %v2124_v0 }
 0x5f3   : > { %1831 = vmatpush3.msra.mxu1 %v2324_v11 }
 0x5f4   : > { %1846 = vmatprep.subr.mxu1 %v2124_v0 }
 0x6ac   : > { %v728_v12 = vpop.f32.mrf.mxu1 }
 0x6ad   : > { %v732_v13 = vadd.f32 %v728_v12, %v2369_v25 }
 0x6ae   : > { %v1812_v14 = vpop.f32.mrf.mxu1 }
 0x6af   : > { %v1663_v15 = vmul.f32 -1.442695, %v732_v13 }
 0x6b1   : > { %1957 = vpow2.f32 %v1663_v15 }
 0x6be   : > { %v1958_v16 = vpop.eup %1957 }
 0x6bf   : > { %v736_v17 = vadd.f32 1.0, %v1958_v16 }
 0x6c1   : > { %1959 = vrcp.f32 %v736_v17 }
 0x6ce   : > { %v1960_v18 = vpop.eup %1959 }
 0x6cf   : > { %v739_v19 = vmul.f32 2.0, %v1960_v18  ;;  %v741_v24 = vmul.f32 %v1960_v18, %v645_v3 }
 0x6d1   : > { %v1664_v20 = vadd.f32 -1.0, %v739_v19 }
 0x6d3   : > { %743 = vrot.lane.b32.xlu0 %v1664_v20, %s2126_s30 }
 0x745   : > { %v744_v21 = vpop.permute.xlu0 %743 }
 0x746   : > { %v746_v22 = vmul.f32 %v1960_v18, %v744_v21 }
 0x748   : > { %748 = vrot.lane.b32.xlu1 %v746_v22, %s2127_s16 }
 0x7ba   : > { %v749_v26 = vpop.permute.xlu1 %748 }
 0x7bb   : > { %v751_v28 = vadd.f32 %v749_v26, %v741_v24  ;;  %v1304_v24 = vld [vmem:[%s2603_s4 + $0x10] sm:$0xff]  ;;  %v1294_v26 = vld [vmem:[#allocation3] sm:$0xff] }
 0x7bd   : > { %1961 = vtanh.f32 %v751_v28 }
 0x7ca   : > { %v1962_v25 = vpop.eup %1961 }
 0x7cb   : > { %754 = vrot.lane.b32.xlu0 %v1962_v25, %s2126_s30  ;;  %v1302_v25 = vld [vmem:[%s2603_s4] sm:$0xff] }
 0x83d   : > { %v755_v30 = vpop.permute.xlu0 %754 }
 0x83e   : > { %v757_v32 = vmul.f32 %v1960_v18, %v755_v30  ;;  %v1295_v30 = vld [vmem:[#allocation3 + $0x8] sm:$0xff] }
 0x840   : > { %759 = vrot.lane.b32.xlu1 %v757_v32, %s2127_s16 }
 0x8b2   : > { %v760_v33 = vpop.permute.xlu1 %759 }
 0x8b3   : > { %763 = vst.msk [vmem:[#allocation3 + $0x10] sm:$0xff] %vm447_vm3, %v760_v33  ;;  %1822 = vmatmul.mubr.msk.f32.vlgmr.msra.gmra.mxu0 %vm447_vm3, %v760_v33 }
 0x8b4   : > { %1836 = vmatpush3.msra.mxu0 %v2306_v5  ;;  %1843 = vmatprep.mubr.msk.f32.mxu0 %vm2125_vm0, %v2124_v0 }
 0x8b5   : > { %1837 = vmatprep.subr.mxu0 %v2124_v0 }
 0x8b6   : > { %1838 = vmatpush3.msra.mxu0 %v2312_v7 }
 0x8b7   : > { %1839 = vmatprep.subr.mxu0 %v2124_v0 }
 0x8b8   : > { %1840 = vmatpush3.msra.mxu0 %v2319_v9 }
 0x8b9   : > { %1841 = vmatprep.subr.mxu0 %v2124_v0 }
 0x8ba   : > { %1842 = vmatpush3.msra.mxu0 %v2324_v11  ;;  %v1296_v32 = vld [vmem:[#allocation3 + $0x10] sm:$0xff] }
 0x8bb   : > { %1857 = vmatprep.subr.mxu0 %v2124_v0 }
 0x973   : > { %v834_v35 = vpop.f32.mrf.mxu0 }
 0x974   : > { %v838_v36 = vadd.f32 %v834_v35, %v2367_v23 }
 0x975   : > { %v1823_v37 = vpop.f32.mrf.mxu0 }
 0x976   : > { %v1666_v38 = vmul.f32 -1.442695, %v838_v36 }
 0x978   : > { %1963 = vpow2.f32 %v1666_v38 }
 0x985   : > { %v1964_v39 = vpop.eup %1963 }
 0x986   : > { %v842_v40 = vadd.f32 1.0, %v1964_v39 }
 0x988   : > { %1965 = vrcp.f32 %v842_v40 }
 0x995   : > { %v1966_v41 = vpop.eup %1965 }
 0x996   : > { %v845_v42 = vmul.f32 2.0, %v1966_v41  ;;  %v847_v46 = vmul.f32 %v1966_v41, %v751_v28  ;;  %v1303_v28 = vld [vmem:[%s2603_s4 + $0x8] sm:$0xff] }
 0x998   : > { %v1667_v43 = vadd.f32 -1.0, %v845_v42 }
 0x99a   : > { %849 = vrot.lane.b32.xlu0 %v1667_v43, %s2126_s30 }
 0xa0c   : > { %v850_v44 = vpop.permute.xlu0 %849 }
 0xa0d   : > { %v852_v45 = vmul.f32 %v1966_v41, %v850_v44 }
 0xa0f   : > { %854 = vrot.lane.b32.xlu1 %v852_v45, %s2127_s16 }
 0xa81   : > { %v855_v47 = vpop.permute.xlu1 %854 }
 0xa82   : > { %v857_v48 = vadd.f32 %v855_v47, %v847_v46 }
 0xa84   : > { %1967 = vtanh.f32 %v857_v48 }
 0xa91   : > { %v1968_v23 = vpop.eup %1967 }
 0xa92   : > { %860 = vrot.lane.b32.xlu0 %v1968_v23, %s2126_s30 }
 0xb04   : > { %v861_v49 = vpop.permute.xlu0 %860 }
 0xb05   : > { %v863_v50 = vmul.f32 %v1966_v41, %v861_v49  ;;  %v2492_v41 = vld [vmem:[%s2604_s5] ss:$0 sm:$0xff] }
 0xb07   : > { %865 = vrot.lane.b32.xlu1 %v863_v50, %s2127_s16 }
 0xb79   : > { %v866_v51 = vpop.permute.xlu1 %865 }
 0xb7a   : > { %869 = vst.msk [vmem:[#allocation3 + $0x18] sm:$0xff] %vm447_vm3, %v866_v51  ;;  %1833 = vmatmul.mubr.msk.f32.vlgmr.msra.gmra.mxu1 %vm447_vm3, %v866_v51  ;;  %v1442_v51 = vlaneseq }
 0xb7b   : > { %1847 = vmatpush3.msra.mxu1 %v2306_v5  ;;  %1854 = vmatprep.mubr.msk.f32.mxu1 %vm2125_vm0, %v2124_v0 }
 0xb7c   : > { %1848 = vmatprep.subr.mxu1 %v2124_v0 }
 0xb7d   : > { %1849 = vmatpush3.msra.mxu1 %v2312_v7 }
 0xb7e   : > { %1850 = vmatprep.subr.mxu1 %v2124_v0 }
 0xb7f   : > { %1851 = vmatpush3.msra.mxu1 %v2319_v9 }
 0xb80   : > { %1852 = vmatprep.subr.mxu1 %v2124_v0 }
 0xb81   : > { %1853 = vmatpush3.msra.mxu1 %v2324_v11  ;;  %v1297_v33 = vld [vmem:[#allocation3 + $0x18] sm:$0xff] }
 0xc3a   : > { %v940_v52 = vpop.f32.mrf.mxu1 }
 0xc3b   : > { %v944_v53 = vadd.f32 %v940_v52, %v2373_v29 }
 0xc3c   : > { %v1834_v54 = vpop.f32.mrf.mxu1 }
 0xc3d   : > { %v1669_v55 = vmul.f32 -1.442695, %v944_v53 }
 0xc3f   : > { %1969 = vpow2.f32 %v1669_v55 }
 0xc4c   : > { %v1970_v56 = vpop.eup %1969 }
 0xc4d   : > { %v948_v57 = vadd.f32 1.0, %v1970_v56 }
 0xc4f   : > { %1971 = vrcp.f32 %v948_v57 }
 0xc5c   : > { %v1972_v58 = vpop.eup %1971 }
 0xc5d   : > { %v951_v59 = vmul.f32 2.0, %v1972_v58  ;;  %v953_v63 = vmul.f32 %v1972_v58, %v857_v48 }
 0xc5f   : > { %v1670_v60 = vadd.f32 -1.0, %v951_v59 }
 0xc61   : > { %955 = vrot.lane.b32.xlu0 %v1670_v60, %s2126_s30  ;;  %v2500_v60 = vand.u32 127, %v1442_v51 }
 0xc63   : > { %vm1445_vm4 = vcmp.lt.s32.totalorder %v2500_v60, 4  ;;  %vm1444_vm5 = vcmp.lt.s32.totalorder %v2500_v60, 2 }
 0xcd3   : > { %v956_v61 = vpop.permute.xlu0 %955 }
 0xcd4   : > { %v958_v62 = vmul.f32 %v1972_v58, %v956_v61 }
 0xcd6   : > { %960 = vrot.lane.b32.xlu1 %v958_v62, %s2127_s16 }
 0xd48   : > { %v961_v1 = vpop.permute.xlu1 %960 }
 0xd49   : > { %v963_v2 = vadd.f32 %v961_v1, %v953_v63 }
 0xd4b   : > { %1973 = vtanh.f32 %v963_v2 }
 0xd58   : > { %v1974_v29 = vpop.eup %1973 }
 0xd59   : > { %966 = vrot.lane.b32.xlu0 %v1974_v29, %s2126_s30 }
 0xdcb   : > { %v967_v3 = vpop.permute.xlu0 %966 }
 0xdcc   : > { %v969_v4 = vmul.f32 %v1972_v58, %v967_v3 }
 0xdce   : > { %971 = vrot.lane.b32.xlu1 %v969_v4, %s2127_s16 }
 0xe40   : > { %v972_v6 = vpop.permute.xlu1 %971 }
 0xe41   : > { %975 = vst.msk [vmem:[#allocation3 + $0x20] sm:$0xff] %vm447_vm3, %v972_v6  ;;  %1844 = vmatmul.mubr.msk.f32.vlgmr.msra.gmra.mxu0 %vm447_vm3, %v972_v6 }
 0xe42   : > { %1858 = vmatpush3.msra.mxu0 %v2306_v5  ;;  %1865 = vmatprep.mubr.msk.f32.mxu0 %vm2125_vm0, %v2124_v0 }
 0xe43   : > { %1859 = vmatprep.subr.mxu0 %v2124_v0 }
 0xe44   : > { %1860 = vmatpush3.msra.mxu0 %v2312_v7 }
 0xe45   : > { %1861 = vmatprep.subr.mxu0 %v2124_v0 }
 0xe46   : > { %1862 = vmatpush3.msra.mxu0 %v2319_v9 }
 0xe47   : > { %1863 = vmatprep.subr.mxu0 %v2124_v0 }
 0xe48   : > { %1864 = vmatpush3.msra.mxu0 %v2324_v11  ;;  %v1298_v35 = vld [vmem:[#allocation3 + $0x20] sm:$0xff] }
 0xf01   : > { %v1046_v8 = vpop.f32.mrf.mxu0 }
 0xf02   : > { %v1050_v10 = vadd.f32 %v1046_v8, %v2371_v27  ;;  %v1305_v27 = vld [vmem:[%s2603_s4 + $0x18] sm:$0xff] }
 0xf03   : > { %v1845_v12 = vpop.f32.mrf.mxu0  ;;  %1868 = vmatprep.subr.mxu1 %v1305_v27 }
 0xf04   : > { %v1672_v5 = vmul.f32 -1.442695, %v1050_v10 }
 0xf06   : > { %1975 = vpow2.f32 %v1672_v5 }
 0xf13   : > { %v1976_v13 = vpop.eup %1975 }
 0xf14   : > { %v1054_v14 = vadd.f32 1.0, %v1976_v13 }
 0xf16   : > { %1977 = vrcp.f32 %v1054_v14 }
 0xf23   : > { %v1978_v15 = vpop.eup %1977 }
 0xf24   : > { %v1057_v16 = vmul.f32 2.0, %v1978_v15  ;;  %v1059_v0 = vmul.f32 %v1978_v15, %v963_v2 }
 0xf26   : > { %v1673_v7 = vadd.f32 -1.0, %v1057_v16 }
 0xf28   : > { %1061 = vrot.lane.b32.xlu0 %v1673_v7, %s2126_s30 }
 0xf9a   : > { %v1062_v17 = vpop.permute.xlu0 %1061 }
 0xf9b   : > { %v1064_v9 = vmul.f32 %v1978_v15, %v1062_v17 }
 0xf9d   : > { %1066 = vrot.lane.b32.xlu1 %v1064_v9, %s2127_s16 }
0x100f   : > { %v1067_v11 = vpop.permute.xlu1 %1066 }
0x1010   : > { %v2463_v18 = vadd.f32 %v1067_v11, %v1059_v0 }
0x1012   : > { %1979 = vtanh.f32 %v2463_v18 }
0x101f   : > { %v1980_v19 = vpop.eup %1979 }
0x1020   : > { %1072 = vrot.lane.b32.xlu0 %v1980_v19, %s2126_s30 }
0x1092   : > { %v1073_v20 = vpop.permute.xlu0 %1072 }
0x1093   : > { %v1075_v21 = vmul.f32 %v1978_v15, %v1073_v20 }
0x1095   : > { %1077 = vrot.lane.b32.xlu1 %v1075_v21, %s2127_s16 }
0x1107   : > { %v1078_v22 = vpop.permute.xlu1 %1077 }
0x1108   : > { %1081 = vst.msk [vmem:[#allocation3 + $0x28] sm:$0xff] %vm447_vm3, %v1078_v22  ;;  %1855 = vmatmul.mubr.msk.f32.vlgmr.msra.gmra.mxu1 %vm447_vm3, %v1078_v22 }
0x1109   : > { %1869 = vmatpush3.msra.mxu1 %v1305_v27  ;;  %1876 = vmatprep.mubr.msk.f32.mxu1 %vm447_vm3, %v1294_v26 }
0x110a   : > { %1870 = vmatprep.subr.mxu1 %v1304_v24 }
0x110b   : > { %1871 = vmatpush3.msra.mxu1 %v1304_v24 }
0x110c   : > { %1872 = vmatprep.subr.mxu1 %v1303_v28 }
0x110d   : > { %1873 = vmatpush3.msra.mxu1 %v1303_v28 }
0x110e   : > { %1874 = vmatprep.subr.mxu1 %v1302_v25 }
0x110f   : > { %1875 = vmatpush3.msra.mxu1 %v1302_v25  ;;  %v1299_v36 = vld [vmem:[#allocation3 + $0x28] sm:$0xff] }
0x1110   : > { %1877 = vmatmul.mubr.msk.f32.vlgmr.msra.gmra.mxu1 %vm447_vm3, %v1295_v30 }
0x1111   : > { %1879 = vmatprep.mubr.msk.f32.mxu1 %vm447_vm3, %v1296_v32 }
0x1114   : > { %1880 = vmatmul.mubr.msk.f32.gmra.mxu1 %vm447_vm3, %v1297_v33 }
0x1115   : > { %1882 = vmatprep.mubr.msk.f32.mxu1 %vm447_vm3, %v1298_v35 }
0x1118   : > { %1883 = vmatmul.mubr.msk.f32.gmra.mxu1 %vm447_vm3, %v1299_v36 }
0x11c8   : > { %v1152_v37 = vpop.f32.mrf.mxu1 }
0x11c9   : > { %v1156_v38 = vadd.f32 %v1152_v37, %v2377_v34 }
0x11ca   : > { %v1856_v39 = vpop.f32.mrf.mxu1 }
0x11cb   : > { %v1675_v40 = vmul.f32 -1.442695, %v1156_v38 }
0x11cd   : > { %1981 = vpow2.f32 %v1675_v40 }
0x11d0   : > { %v1878_v42 = vpop.f32.mrf.mxu1 }
0x11d1   : > { %v1409_v43 = vadd.f32 %v1878_v42, %v2492_v41 }
0x11d2   : > { %v1403_v44 = vpop.f32.mrf.mxu1 }
0x11d3   : > { %v1448_v45 = vmul.f32 1.442695, %v1409_v43  ;;  %v1404_v46 = vadd.f32 %v2492_v41, %v1403_v44  ;;  %1983 = vtanh.f32 %v1409_v43 }
0x11d4   : > { %v1881_v47 = vpop.f32.mrf.mxu1 }
0x11d5   : > { %1985 = vpow2.f32 %v1448_v45  ;;  %v1446_v48 = vmul.f32 1.442695, %v1404_v46  ;;  %v1419_v34 = vadd.f32 %v1881_v47, %v2492_v41 }
0x11d6   : > { %1987 = vtanh.f32 %v1404_v46  ;;  %v1413_v23 = vpop.f32.mrf.mxu1 }
0x11d7   : > { %1989 = vpow2.f32 %v1446_v48  ;;  %v1452_v49 = vmul.f32 1.442695, %v1419_v34  ;;  %v1414_v50 = vadd.f32 %v2492_v41, %v1413_v23 }
0x11d8   : > { %1991 = vtanh.f32 %v1419_v34  ;;  %v1884_v52 = vpop.f32.mrf.mxu1 }
0x11d9   : > { %1993 = vpow2.f32 %v1452_v49  ;;  %v1450_v53 = vmul.f32 1.442695, %v1414_v50  ;;  %v1429_v54 = vadd.f32 %v1884_v52, %v2492_v41 }
0x11da   : > { %v1982_v55 = vpop.eup %1981  ;;  %1995 = vtanh.f32 %v1414_v50  ;;  %v1423_v56 = vpop.f32.mrf.mxu1 }
0x11db   : > { %v1160_v57 = vadd.f32 1.0, %v1982_v55  ;;  %1997 = vpow2.f32 %v1450_v53  ;;  %v1456_v58 = vmul.f32 1.442695, %v1429_v54  ;;  %v1424_v59 = vadd.f32 %v2492_v41, %v1423_v56 }
0x11dc   : > { %1999 = vtanh.f32 %v1429_v54 }
0x11dd   : > { %2001 = vrcp.f32 %v1160_v57  ;;  %v1454_v61 = vmul.f32 1.442695, %v1424_v59 }
0x11de   : > { %2003 = vpow2.f32 %v1456_v58 }
0x11df   : > { %2005 = vpow2.f32 %v1454_v61 }
0x11e0   : > { %2007 = vtanh.f32 %v1424_v59  ;;  %v1984_v62 = vpop.eup %1983 }
0x11e2   : > { %v1986_v63 = vpop.eup %1985 }
0x11e3   : > { %v1988_v1 = vpop.eup %1987  ;;  %v1471_v2 = vsel %vm1445_vm4, %v1986_v63, %v1984_v62 }
0x11e4   : > { %v1990_v29 = vpop.eup %1989  ;;  %v1479_v3 = vsel %vm1444_vm5, %v1409_v43, %v1471_v2 }
0x11e5   : > { %v1992_v4 = vpop.eup %1991  ;;  %1488 = vst.msk [vmem:[%s2509_s12 + $0x8] sm:$0xff] %vm1486_vm6, %v1479_v3  ;;  %v1470_v6 = vsel %vm1445_vm4, %v1990_v29, %v1988_v1 }
0x11e6   : > { %v1994_v8 = vpop.eup %1993  ;;  %v1478_v10 = vsel %vm1444_vm5, %v1404_v46, %v1470_v6 }
0x11e7   : > { %v1996_v12 = vpop.eup %1995  ;;  %1487 = vst.msk [vmem:[%s2509_s12] sm:$0xff] %vm1486_vm6, %v1478_v10  ;;  %v1473_v5 = vsel %vm1445_vm4, %v1994_v8, %v1992_v4 }
0x11e8   : > { %v1998_v13 = vpop.eup %1997  ;;  %v1481_v14 = vsel %vm1444_vm5, %v1419_v34, %v1473_v5 }
0x11e9   : > { %v2000_v15 = vpop.eup %1999  ;;  %1490 = vst.msk [vmem:[%s2509_s12 + $0x18] sm:$0xff] %vm1486_vm6, %v1481_v14  ;;  %v1472_v16 = vsel %vm1445_vm4, %v1998_v13, %v1996_v12 }
0x11ea   : > { %v2002_v7 = vpop.eup %2001  ;;  %v1480_v17 = vsel %vm1444_vm5, %v1414_v50, %v1472_v16 }
0x11eb   : > { %v2004_v9 = vpop.eup %2003  ;;  %1489 = vst.msk [vmem:[%s2509_s12 + $0x10] sm:$0xff] %vm1486_vm6, %v1480_v17  ;;  %v1163_v0 = vmul.f32 2.0, %v2002_v7  ;;  %v1165_v25 = vmul.f32 %v2002_v7, %v2463_v18 }
0x11ec   : > { %v2006_v11 = vpop.eup %2005  ;;  %v1475_v27 = vsel %vm1445_vm4, %v2004_v9, %v2000_v15  ;;  %v1548_v8 = vld [vmem:[%s2509_s12 + $0x8] sm:$0xff] (%p2619_p13) }
0x11ed   : > { %v2008_v19 = vpop.eup %2007  ;;  %v1483_v20 = vsel %vm1444_vm5, %v1429_v54, %v1475_v27  ;;  %v1676_v21 = vadd.f32 -1.0, %v1163_v0  ;;  %1549 = vst [vmem:[%s1503_s21 + $0x10] sm:$0xff] (%p2619_p13), %v1548_v8 }
0x11ee   : > { %1492 = vst.msk [vmem:[%s2509_s12 + $0x28] sm:$0xff] %vm1486_vm6, %v1483_v20  ;;  %v1474_v22 = vsel %vm1445_vm4, %v2006_v11, %v2008_v19  ;;  %v1546_v6 = vld [vmem:[%s2509_s12] sm:$0xff] (%p2619_p13) }
0x11ef   : > { %v1482_v24 = vsel %vm1444_vm5, %v1424_v59, %v1474_v22  ;;  %1167 = vrot.lane.b32.xlu0 %v1676_v21, %s2126_s30  ;;  %1547 = vst [vmem:[%s1503_s21] sm:$0xff] (%p2619_p13), %v1546_v6 }
0x11f0   : > { %1491 = vst.msk [vmem:[%s2509_s12 + $0x20] sm:$0xff] %vm1486_vm6, %v1482_v24  ;;  %v1552_v60 = vld [vmem:[%s2509_s12 + $0x18] sm:$0xff] (%p2619_p13) }
0x11f1   : > { %1553 = vst [vmem:[%s1503_s21 + $0x30] sm:$0xff] (%p2619_p13), %v1552_v60 }
0x11f2   : > { %v1550_v10 = vld [vmem:[%s2509_s12 + $0x10] sm:$0xff] (%p2619_p13) }
0x11f3   : > { %1551 = vst [vmem:[%s1503_s21 + $0x20] sm:$0xff] (%p2619_p13), %v1550_v10 }
0x11f5   : > { %v1556_v5 = vld [vmem:[%s2509_s12 + $0x28] sm:$0xff] (%p2619_p13) }
0x11f6   : > { %1557 = vst [vmem:[%s1503_s21 + $0x50] sm:$0xff] (%p2619_p13), %v1556_v5 }
0x11f7   : > { %v1554_v12 = vld [vmem:[%s2509_s12 + $0x20] sm:$0xff] (%p2619_p13) }
0x11f8   : > { %1555 = vst [vmem:[%s1503_s21 + $0x40] sm:$0xff] (%p2619_p13), %v1554_v12 }
0x1261   : > { %v1168_v26 = vpop.permute.xlu0 %1167 }
0x1262   : > { %v1170_v28 = vmul.f32 %v2002_v7, %v1168_v26 }
0x1264   : > { %1172 = vrot.lane.b32.xlu1 %v1170_v28, %s2127_s16 }
0x12d6   : > { %v1173_v30 = vpop.permute.xlu1 %1172 }
0x12d7   : > { %v1175_v32 = vadd.f32 %v1173_v30, %v1165_v25 }
0x12d9   : > { %2009 = vtanh.f32 %v1175_v32 }
0x12e6   : > { %v2010_v33 = vpop.eup %2009 }
0x12e7   : > { %1178 = vrot.lane.b32.xlu0 %v2010_v33, %s2126_s30 }
0x1359   : > { %v1179_v35 = vpop.permute.xlu0 %1178 }
0x135a   : > { %v1181_v36 = vmul.f32 %v2002_v7, %v1179_v35 }
0x135c   : > { %1183 = vrot.lane.b32.xlu1 %v1181_v36, %s2127_s16 }
0x13ce   : > { %v1184_v37 = vpop.permute.xlu1 %1183 }
0x13cf   : > { %1187 = vst.msk [vmem:[#allocation3 + $0x30] sm:$0xff] %vm447_vm3, %v1184_v37  ;;  %1866 = vmatmul.mubr.msk.f32.vlgmr.msra.gmra.mxu0 %vm447_vm3, %v1184_v37 }
0x13d6   : > { %v1300_v38 = vld [vmem:[#allocation3 + $0x30] sm:$0xff] }
0x13d7   : > { %1885 = vmatprep.mubr.msk.f32.mxu1 %vm447_vm3, %v1300_v38 }
0x148f   : > { %v1258_v39 = vpop.f32.mrf.mxu0 }
0x1490   : > { %v1262_v18 = vadd.f32 %v1258_v39, %v2375_v31 }
0x1491   : > { %v1867_v40 = vpop.f32.mrf.mxu0 }
0x1492   : > { %v1678_v42 = vmul.f32 -1.442695, %v1262_v18 }
0x1494   : > { %2011 = vpow2.f32 %v1678_v42 }
0x14a1   : > { %v2012_v43 = vpop.eup %2011 }
0x14a2   : > { %v1266_v44 = vadd.f32 1.0, %v2012_v43 }
0x14a4   : > { %2013 = vrcp.f32 %v1266_v44 }
0x14b1   : > { %v2014_v45 = vpop.eup %2013 }
0x14b2   : > { %v1269_v46 = vmul.f32 2.0, %v2014_v45  ;;  %v1271_v23 = vmul.f32 %v2014_v45, %v1175_v32 }
0x14b4   : > { %v1679_v47 = vadd.f32 -1.0, %v1269_v46 }
0x14b6   : > { %1273 = vrot.lane.b32.xlu0 %v1679_v47, %s2126_s30 }
0x1528   : > { %v1274_v48 = vpop.permute.xlu0 %1273 }
0x1529   : > { %v1276_v34 = vmul.f32 %v2014_v45, %v1274_v48 }
0x152b   : > { %1278 = vrot.lane.b32.xlu1 %v1276_v34, %s2127_s16 }
0x159d   : > { %v1279_v49 = vpop.permute.xlu1 %1278 }
0x159e   : > { %v1281_v50 = vadd.f32 %v1279_v49, %v1271_v23 }
0x15a0   : > { %2015 = vtanh.f32 %v1281_v50 }
0x15ad   : > { %v2016_v31 = vpop.eup %2015 }
0x15ae   : > { %1284 = vrot.lane.b32.xlu0 %v2016_v31, %s2126_s30 }
0x1620   : > { %v1285_v51 = vpop.permute.xlu0 %1284 }
0x1621   : > { %v1287_v52 = vmul.f32 %v2014_v45, %v1285_v51 }
0x1623   : > { %1289 = vrot.lane.b32.xlu1 %v1287_v52, %s2127_s16 }
0x1695   : > { %v1290_v53 = vpop.permute.xlu1 %1289 }
0x1696   : > { %1293 = vst.msk [vmem:[#allocation3 + $0x38] sm:$0xff] %vm447_vm3, %v1290_v53 }
0x169d   : > { %v1301_v54 = vld [vmem:[#allocation3 + $0x38] sm:$0xff] }
0x169e   : > { %1886 = vmatmul.mubr.msk.f32.gmra.mxu1 %vm447_vm3, %v1301_v54 }
0x175e   : > { %v1887_v55 = vpop.f32.mrf.mxu1 }
0x175f   : > { %v1439_v56 = vadd.f32 %v1887_v55, %v2492_v41 }
0x1760   : > { %v1433_v57 = vpop.f32.mrf.mxu1 }
0x1761   : > { %v1460_v58 = vmul.f32 1.442695, %v1439_v56  ;;  %v1434_v59 = vadd.f32 %v2492_v41, %v1433_v57  ;;  %2017 = vtanh.f32 %v1439_v56 }
0x1763   : > { %2019 = vpow2.f32 %v1460_v58  ;;  %v1458_v61 = vmul.f32 1.442695, %v1434_v59 }
0x1764   : > { %2021 = vtanh.f32 %v1434_v59 }
0x1765   : > { %2023 = vpow2.f32 %v1458_v61 }
0x176e   : > { %v2018_v62 = vpop.eup %2017 }
0x1770   : > { %v2020_v63 = vpop.eup %2019 }
0x1771   : > { %v2022_v1 = vpop.eup %2021  ;;  %v1477_v2 = vsel %vm1445_vm4, %v2020_v63, %v2018_v62  ;;  %1501 = sbr.rel (!%p2619_p13) target bundleno = 6014 (0x177e), region = 56 }
0x1772   : > { %v2024_v29 = vpop.eup %2023  ;;  %v1485_v3 = vsel %vm1444_vm5, %v1439_v56, %v1477_v2 }
0x1773   : > { %1494 = vst.msk [vmem:[%s2509_s12 + $0x38] sm:$0xff] %vm1486_vm6, %v1485_v3  ;;  %v1476_v41 = vsel %vm1445_vm4, %v2024_v29, %v2022_v1 }
0x1774   : > { %v1484_v4 = vsel %vm1444_vm5, %v1434_v59, %v1476_v41 }
0x1775   : > { %1493 = vst.msk [vmem:[%s2509_s12 + $0x30] sm:$0xff] %vm1486_vm6, %v1484_v4 }
0x177a   : > { %v1560_v14 = vld [vmem:[%s2509_s12 + $0x38] sm:$0xff] }
0x177b   : > { %1561 = vst [vmem:[%s1503_s21 + $0x70] sm:$0xff] %v1560_v14 }
0x177c   : > { %v1558_v13 = vld [vmem:[%s2509_s12 + $0x30] sm:$0xff] }
0x177d   : > { %1559 = vst [vmem:[%s1503_s21 + $0x60] sm:$0xff] %v1558_v13 }
0x177e PF: > { %p17_p0 = scmp.ge.s32.totalorder %s2185_s26, 4   ;;  %s2620_s21 = smov %s2109_s22 }
0x177f   : > { %s2621_s22 = smov %s2113_s23  ;;  %s2622_s23 = smov %s2195_s29 }
0x1780   : > { %s2623_s24 = smov %s2185_s26  ;;  %19 = sbr.rel (!%p17_p0) target bundleno = 4 (0x4), region = 140 }
0x1785   :  { %1577 = vsyncpa [#allocation5], 1 }
0x1786   :  { %1579 = vsyncpa [#allocation5 + $0x1], 1 }
0x1787   :  { %1580 = vsyncpa [#allocation7], 1 }

</bundles_post_ra>
